<compile_context>
chip_gen: v7x
topology: tpu7x:2x2x1
jax: 0.10.0
libtpu: 0.0.40
codegen_flags: <defaults>
</compile_context>

<pallas_src>
import functools
import math

import jax
import jax.numpy as jnp
from jax.experimental import pallas as pl
from jax.experimental.pallas import tpu as pltpu


def _round_up(x, m):
    return ((x + m - 1) // m) * m


def _pad_to(a, shape):
    pads = tuple((0, s - d) for d, s in zip(a.shape, shape))
    if all(p == (0, 0) for p in pads):
        return a
    return jnp.pad(a, pads)


def _mlp_kernel(x_ref, w1_ref, b1_ref, w2_ref, b2_ref, w3_ref, b3_ref, o_ref,
                *, compute_dtype):
    """Fused 3-layer MLP on one batch tile; weights fully resident in VMEM."""
    cd = compute_dtype
    x = x_ref[...]

    h1 = jnp.dot(x.astype(cd), w1_ref[...].astype(cd),
                 preferred_element_type=jnp.float32) + b1_ref[...]
    h1 = jnp.maximum(h1, 0.0)                                   # ReLU (f32 VPU)

    h2 = jnp.dot(h1.astype(cd), w2_ref[...].astype(cd),
                 preferred_element_type=jnp.float32) + b2_ref[...]
    h2 = jnp.maximum(h2, 0.0)                                   # ReLU (f32 VPU)

    y = jnp.dot(h2.astype(cd), w3_ref[...].astype(cd),
                preferred_element_type=jnp.float32) + b3_ref[...]
    o_ref[...] = y.astype(o_ref.dtype)


def _vmem_limit_bytes():
    """Explicit scoped-VMEM budget: physical minus headroom, capped at 100 MiB."""
    try:
        cap = pltpu.get_tpu_info().vmem_capacity_bytes
    except Exception:
        cap = 64 * 1024 * 1024  # conservative (v7x per-TC VMEM)
    return int(min(cap - 8 * 1024 * 1024, 100 * 1024 * 1024))


def mlp_forward(x, params, *, batch_tile=256, compute_dtype=jnp.bfloat16):
    """y = relu(relu(x@w1+b1)@w2+b2)@w3+b3 as one fused Pallas TPU kernel.

    x: (B, input_dim). Weights are stored transposed vs. torch.nn.Linear, i.e.
    w1 (in,h), b1 (1,h), w2 (h,h), b2 (1,h), w3 (h,out), b3 (1,out).
    """
    w1, b1, w2, b2, w3, b3 = (params[k] for k in ("w1", "b1", "w2", "b2", "w3", "b3"))
    B, in_dim = x.shape
    hidden = w1.shape[1]
    out_dim = w3.shape[1]

    # Lane-pad feature dims to multiples of 128 (full MXU panels, unmasked stores).
    in_p = _round_up(in_dim, 128)
    hid_p = _round_up(hidden, 128)
    out_p = _round_up(out_dim, 128)

    # Batch tile: multiple of 8 sublanes (ideally 128+ for the MXU M dim); pad the
    # batch so the tile divides it. Padded rows are sliced off at the end.
    bt = max(8, min(batch_tile, _round_up(B, 8)))
    bt = (bt // 8) * 8
    B_p = _round_up(B, bt)
    grid = (B_p // bt,)

    # TODO(synk): for hidden >= ~2K the fully-resident w2 (h*h*4B) no longer fits
    # VMEM (esp. v7x 64 MiB); add grid tiling over the K/N feature dims then.

    x_p = _pad_to(x, (B_p, in_p))
    w1_p = _pad_to(w1, (in_p, hid_p))
    b1_p = _pad_to(b1, (1, hid_p))
    w2_p = _pad_to(w2, (hid_p, hid_p))
    b2_p = _pad_to(b2, (1, hid_p))
    w3_p = _pad_to(w3, (hid_p, out_p))
    b3_p = _pad_to(b3, (1, out_p))

    flops = 2 * B_p * (in_p * hid_p + hid_p * hid_p + hid_p * out_p)
    bytes_accessed = 4 * (B_p * in_p + B_p * out_p
                          + in_p * hid_p + hid_p * hid_p + hid_p * out_p
                          + 2 * hid_p + out_p)
    cost = pl.CostEstimate(flops=flops, transcendentals=0,
                           bytes_accessed=bytes_accessed)

    kernel = functools.partial(_mlp_kernel, compute_dtype=compute_dtype)

    def build_call(single_buffer_weights):
        if single_buffer_weights:
            # Weights/biases never change across grid steps: one VMEM buffer each.
            def const_spec(shape):
                return pl.BlockSpec(shape, lambda i: (0, 0),
                                    pipeline_mode=pl.Buffered(1))
        else:
            def const_spec(shape):
                return pl.BlockSpec(shape, lambda i: (0, 0))

        in_specs = [
            pl.BlockSpec((bt, in_p), lambda i: (i, 0)),   # x: tiled over batch
            const_spec((in_p, hid_p)),                    # w1
            const_spec((1, hid_p)),                       # b1
            const_spec((hid_p, hid_p)),                   # w2
            const_spec((1, hid_p)),                       # b2
            const_spec((hid_p, out_p)),                   # w3
            const_spec((1, out_p)),                       # b3
        ]
        out_spec = pl.BlockSpec((bt, out_p), lambda i: (i, 0))

        return pl.pallas_call(
            kernel,
            out_shape=jax.ShapeDtypeStruct((B_p, out_p), x.dtype),
            grid_spec=pltpu.PrefetchScalarGridSpec(
                num_scalar_prefetch=0,
                grid=grid,
                in_specs=in_specs,
                out_specs=out_spec,
            ),
            compiler_params=pltpu.CompilerParams(
                dimension_semantics=("parallel",),
                vmem_limit_bytes=_vmem_limit_bytes(),
            ),
            cost_estimate=cost,
        )

    args = (x_p, w1_p, b1_p, w2_p, b2_p, w3_p, b3_p)
    try:
        y_p = build_call(single_buffer_weights=True)(*args)
    except Exception:
        # jax build without BlockSpec.pipeline_mode / Buffered(1) support:
        # fall back to default double-buffered weight blocks (correct, more VMEM).
        y_p = build_call(single_buffer_weights=False)(*args)

    return y_p[:B, :out_dim]


def init_params(key, input_dim, hidden_dim, out_dim, dtype=jnp.float32):
    """torch.nn.Linear-style init: U(-1/sqrt(fan_in), 1/sqrt(fan_in))."""
    ks = jax.random.split(key, 6)

    def lin(kw, kb, fan_in, fan_out):
        bound = 1.0 / math.sqrt(fan_in)
        w = jax.random.uniform(kw, (fan_in, fan_out), dtype, -bound, bound)
        b = jax.random.uniform(kb, (1, fan_out), dtype, -bound, bound)
        return w, b

    w1, b1 = lin(ks[0], ks[1], input_dim, hidden_dim)
    w2, b2 = lin(ks[2], ks[3], hidden_dim, hidden_dim)
    w3, b3 = lin(ks[4], ks[5], hidden_dim, out_dim)
    return {"w1": w1, "b1": b1, "w2": w2, "b2": b2, "w3": w3, "b3": b3}


def mlp_ref(x, p, compute_dtype=jnp.float32):
    def dot(a, b):
        return jnp.dot(a.astype(compute_dtype), b.astype(compute_dtype),
                       preferred_element_type=jnp.float32)
    h1 = jnp.maximum(dot(x, p["w1"]) + p["b1"], 0.0)
    h2 = jnp.maximum(dot(h1, p["w2"]) + p["b2"], 0.0)
    return dot(h2, p["w3"]) + p["b3"]


if __name__ == "__main__":
    key = jax.random.PRNGKey(0)
    k_x, k_p = jax.random.split(key)

    # Small demo shapes; batch=300 exercises the ragged-batch padding path and
    # batch_tile=128 gives a multi-step grid (real pipelining / megacore split).
    batch, input_dim, hidden_dim, out_dim = 300, 32, 64, 16
    x = jax.random.normal(k_x, (batch, input_dim), jnp.float32)
    params = init_params(k_p, input_dim, hidden_dim, out_dim)

    out = mlp_forward(x, params, batch_tile=128)
    out = jax.block_until_ready(out)
    assert out.shape == (batch, out_dim)

    # Matched-precision reference (bf16 operands, f32 accumulation).
    ref_bf16 = mlp_ref(x, params, compute_dtype=jnp.bfloat16)
    assert jnp.allclose(out, ref_bf16, atol=2e-3, rtol=2e-2), "mismatch vs bf16 ref"

    # Full-f32 reference: only bf16-operand rounding error expected.
    ref_f32 = mlp_ref(x, params, compute_dtype=jnp.float32)
    assert jnp.allclose(out, ref_f32, atol=5e-2, rtol=5e-2), "mismatch vs f32 ref"

    print("KERNEL_OK")
</pallas_src>

<mosaic_0001>
module attributes {stable_mosaic.version = 11 : i64} {
  func.func @_mlp_kernel(%arg0: i32, %arg1: memref<128x128xf32, #tpu.memory_space<vmem>>, %arg2: memref<128x128xf32, #tpu.memory_space<vmem>>, %arg3: memref<1x128xf32, #tpu.memory_space<vmem>>, %arg4: memref<128x128xf32, #tpu.memory_space<vmem>>, %arg5: memref<1x128xf32, #tpu.memory_space<vmem>>, %arg6: memref<128x128xf32, #tpu.memory_space<vmem>>, %arg7: memref<1x128xf32, #tpu.memory_space<vmem>>, %arg8: memref<128x128xf32, #tpu.memory_space<vmem>>) attributes {dimension_semantics = [#tpu.dimension_semantics<parallel>], iteration_bounds = array<i64: 3>, scalar_prefetch = 0 : i64, scratch_operands = 0 : i64, tpu.core_type = #tpu.core_type<tc>, window_params = [{transform_indices = @transform_0, window_bounds = array<i64: 128, 128>}, {pipeline_mode = #tpu.pipeline_mode<synchronous>, transform_indices = @transform_1, window_bounds = array<i64: 128, 128>}, {pipeline_mode = #tpu.pipeline_mode<synchronous>, transform_indices = @transform_2, window_bounds = array<i64: 1, 128>}, {pipeline_mode = #tpu.pipeline_mode<synchronous>, transform_indices = @transform_3, window_bounds = array<i64: 128, 128>}, {pipeline_mode = #tpu.pipeline_mode<synchronous>, transform_indices = @transform_4, window_bounds = array<i64: 1, 128>}, {pipeline_mode = #tpu.pipeline_mode<synchronous>, transform_indices = @transform_5, window_bounds = array<i64: 128, 128>}, {pipeline_mode = #tpu.pipeline_mode<synchronous>, transform_indices = @transform_6, window_bounds = array<i64: 1, 128>}, {transform_indices = @transform_7, window_bounds = array<i64: 128, 128>}]} {
    %c0 = arith.constant 0 : index
    %c0_0 = arith.constant 0 : index
    %0 = vector.load %arg1[%c0, %c0_0] : memref<128x128xf32, #tpu.memory_space<vmem>>, vector<128x128xf32>
    %1 = arith.truncf %0 : vector<128x128xf32> to vector<128x128xbf16>
    %c0_1 = arith.constant 0 : index
    %c0_2 = arith.constant 0 : index
    %2 = vector.load %arg2[%c0_1, %c0_2] : memref<128x128xf32, #tpu.memory_space<vmem>>, vector<128x128xf32>
    %3 = arith.truncf %2 : vector<128x128xf32> to vector<128x128xbf16>
    %cst = arith.constant dense<0.000000e+00> : vector<128x128xf32>
    %4 = tpu.matmul %1, %3, %cst {dimension_numbers = #tpu.dot_dimension_numbers<[1], [0], [0], [1], [0, 0, 1, 1], [], []>} : vector<128x128xbf16>, vector<128x128xbf16>, vector<128x128xf32> -> vector<128x128xf32>
    %c0_3 = arith.constant 0 : index
    %c0_4 = arith.constant 0 : index
    %5 = vector.load %arg3[%c0_3, %c0_4] : memref<1x128xf32, #tpu.memory_space<vmem>>, vector<1x128xf32>
    %6 = vector.broadcast %5 : vector<1x128xf32> to vector<128x128xf32>
    %7 = arith.addf %4, %6 : vector<128x128xf32>
    %cst_5 = arith.constant 0.000000e+00 : f32
    %8 = vector.broadcast %cst_5 : f32 to vector<128x128xf32>
    %9 = arith.maximumf %7, %8 : vector<128x128xf32>
    %10 = arith.truncf %9 : vector<128x128xf32> to vector<128x128xbf16>
    %c0_6 = arith.constant 0 : index
    %c0_7 = arith.constant 0 : index
    %11 = vector.load %arg4[%c0_6, %c0_7] : memref<128x128xf32, #tpu.memory_space<vmem>>, vector<128x128xf32>
    %12 = arith.truncf %11 : vector<128x128xf32> to vector<128x128xbf16>
    %cst_8 = arith.constant dense<0.000000e+00> : vector<128x128xf32>
    %13 = tpu.matmul %10, %12, %cst_8 {dimension_numbers = #tpu.dot_dimension_numbers<[1], [0], [0], [1], [0, 0, 1, 1], [], []>} : vector<128x128xbf16>, vector<128x128xbf16>, vector<128x128xf32> -> vector<128x128xf32>
    %c0_9 = arith.constant 0 : index
    %c0_10 = arith.constant 0 : index
    %14 = vector.load %arg5[%c0_9, %c0_10] : memref<1x128xf32, #tpu.memory_space<vmem>>, vector<1x128xf32>
    %15 = vector.broadcast %14 : vector<1x128xf32> to vector<128x128xf32>
    %16 = arith.addf %13, %15 : vector<128x128xf32>
    %cst_11 = arith.constant 0.000000e+00 : f32
    %17 = vector.broadcast %cst_11 : f32 to vector<128x128xf32>
    %18 = arith.maximumf %16, %17 : vector<128x128xf32>
    %19 = arith.truncf %18 : vector<128x128xf32> to vector<128x128xbf16>
    %c0_12 = arith.constant 0 : index
    %c0_13 = arith.constant 0 : index
    %20 = vector.load %arg6[%c0_12, %c0_13] : memref<128x128xf32, #tpu.memory_space<vmem>>, vector<128x128xf32>
    %21 = arith.truncf %20 : vector<128x128xf32> to vector<128x128xbf16>
    %cst_14 = arith.constant dense<0.000000e+00> : vector<128x128xf32>
    %22 = tpu.matmul %19, %21, %cst_14 {dimension_numbers = #tpu.dot_dimension_numbers<[1], [0], [0], [1], [0, 0, 1, 1], [], []>} : vector<128x128xbf16>, vector<128x128xbf16>, vector<128x128xf32> -> vector<128x128xf32>
    %c0_15 = arith.constant 0 : index
    %c0_16 = arith.constant 0 : index
    %23 = vector.load %arg7[%c0_15, %c0_16] : memref<1x128xf32, #tpu.memory_space<vmem>>, vector<1x128xf32>
    %24 = vector.broadcast %23 : vector<1x128xf32> to vector<128x128xf32>
    %25 = arith.addf %22, %24 : vector<128x128xf32>
    %c0_17 = arith.constant 0 : index
    %c0_18 = arith.constant 0 : index
    %26 = vector.load %arg8[%c0_17, %c0_18] : memref<128x128xf32, #tpu.memory_space<vmem>>, vector<128x128xf32>
    tpu.vector_store %arg8[%c0_17, %c0_18], %25 {strides = array<i32>} : memref<128x128xf32, #tpu.memory_space<vmem>>, vector<128x128xf32>,
    return
  }
  func.func @transform_0(%arg0: i32) -> (i32, i32) {
    %c0_i32 = arith.constant 0 : i32
    %c0_i32_0 = arith.constant 0 : i32
    return %arg0, %c0_i32 : i32, i32
  }
  func.func @transform_1(%arg0: i32) -> (i32, i32) {
    %c0_i32 = arith.constant 0 : i32
    %c0_i32_0 = arith.constant 0 : i32
    %c0_i32_1 = arith.constant 0 : i32
    return %c0_i32, %c0_i32_0 : i32, i32
  }
  func.func @transform_2(%arg0: i32) -> (i32, i32) {
    %c0_i32 = arith.constant 0 : i32
    %c0_i32_0 = arith.constant 0 : i32
    %c0_i32_1 = arith.constant 0 : i32
    return %c0_i32, %c0_i32_0 : i32, i32
  }
  func.func @transform_3(%arg0: i32) -> (i32, i32) {
    %c0_i32 = arith.constant 0 : i32
    %c0_i32_0 = arith.constant 0 : i32
    %c0_i32_1 = arith.constant 0 : i32
    return %c0_i32, %c0_i32_0 : i32, i32
  }
  func.func @transform_4(%arg0: i32) -> (i32, i32) {
    %c0_i32 = arith.constant 0 : i32
    %c0_i32_0 = arith.constant 0 : i32
    %c0_i32_1 = arith.constant 0 : i32
    return %c0_i32, %c0_i32_0 : i32, i32
  }
  func.func @transform_5(%arg0: i32) -> (i32, i32) {
    %c0_i32 = arith.constant 0 : i32
    %c0_i32_0 = arith.constant 0 : i32
    %c0_i32_1 = arith.constant 0 : i32
    return %c0_i32, %c0_i32_0 : i32, i32
  }
  func.func @transform_6(%arg0: i32) -> (i32, i32) {
    %c0_i32 = arith.constant 0 : i32
    %c0_i32_0 = arith.constant 0 : i32
    %c0_i32_1 = arith.constant 0 : i32
    return %c0_i32, %c0_i32_0 : i32, i32
  }
  func.func @transform_7(%arg0: i32) -> (i32, i32) {
    %c0_i32 = arith.constant 0 : i32
    %c0_i32_0 = arith.constant 0 : i32
    return %arg0, %c0_i32 : i32, i32
  }
}

module attributes {stable_mosaic.version = 11 : i64} {
  func.func @_mlp_kernel(%arg0: i32, %arg1: memref<128x128xf32, #tpu.memory_space<vmem>>, %arg2: memref<128x128xf32, #tpu.memory_space<vmem>>, %arg3: memref<1x128xf32, #tpu.memory_space<vmem>>, %arg4: memref<128x128xf32, #tpu.memory_space<vmem>>, %arg5: memref<1x128xf32, #tpu.memory_space<vmem>>, %arg6: memref<128x128xf32, #tpu.memory_space<vmem>>, %arg7: memref<1x128xf32, #tpu.memory_space<vmem>>, %arg8: memref<128x128xf32, #tpu.memory_space<vmem>>) attributes {dimension_semantics = [#tpu.dimension_semantics<parallel>], iteration_bounds = array<i64: 3>, scalar_prefetch = 0 : i64, scratch_operands = 0 : i64, tpu.core_type = #tpu.core_type<tc>, window_params = [{transform_indices = @transform_0, window_bounds = array<i64: 128, 128>}, {pipeline_mode = #tpu.pipeline_mode<synchronous>, transform_indices = @transform_1, window_bounds = array<i64: 128, 128>}, {pipeline_mode = #tpu.pipeline_mode<synchronous>, transform_indices = @transform_2, window_bounds = array<i64: 1, 128>}, {pipeline_mode = #tpu.pipeline_mode<synchronous>, transform_indices = @transform_3, window_bounds = array<i64: 128, 128>}, {pipeline_mode = #tpu.pipeline_mode<synchronous>, transform_indices = @transform_4, window_bounds = array<i64: 1, 128>}, {pipeline_mode = #tpu.pipeline_mode<synchronous>, transform_indices = @transform_5, window_bounds = array<i64: 128, 128>}, {pipeline_mode = #tpu.pipeline_mode<synchronous>, transform_indices = @transform_6, window_bounds = array<i64: 1, 128>}, {transform_indices = @transform_7, window_bounds = array<i64: 128, 128>}]} {
    %c0 = arith.constant 0 : index
    %c0_0 = arith.constant 0 : index
    %0 = vector.load %arg1[%c0, %c0_0] : memref<128x128xf32, #tpu.memory_space<vmem>>, vector<128x128xf32>
    %1 = arith.truncf %0 : vector<128x128xf32> to vector<128x128xbf16>
    %c0_1 = arith.constant 0 : index
    %c0_2 = arith.constant 0 : index
    %2 = vector.load %arg2[%c0_1, %c0_2] : memref<128x128xf32, #tpu.memory_space<vmem>>, vector<128x128xf32>
    %3 = arith.truncf %2 : vector<128x128xf32> to vector<128x128xbf16>
    %cst = arith.constant dense<0.000000e+00> : vector<128x128xf32>
    %4 = tpu.matmul %1, %3, %cst {dimension_numbers = #tpu.dot_dimension_numbers<[1], [0], [0], [1], [0, 0, 1, 1], [], []>} : vector<128x128xbf16>, vector<128x128xbf16>, vector<128x128xf32> -> vector<128x128xf32>
    %c0_3 = arith.constant 0 : index
    %c0_4 = arith.constant 0 : index
    %5 = vector.load %arg3[%c0_3, %c0_4] : memref<1x128xf32, #tpu.memory_space<vmem>>, vector<1x128xf32>
    %6 = vector.broadcast %5 : vector<1x128xf32> to vector<128x128xf32>
    %7 = arith.addf %4, %6 : vector<128x128xf32>
    %cst_5 = arith.constant 0.000000e+00 : f32
    %8 = vector.broadcast %cst_5 : f32 to vector<128x128xf32>
    %9 = arith.maximumf %7, %8 : vector<128x128xf32>
    %10 = arith.truncf %9 : vector<128x128xf32> to vector<128x128xbf16>
    %c0_6 = arith.constant 0 : index
    %c0_7 = arith.constant 0 : index
    %11 = vector.load %arg4[%c0_6, %c0_7] : memref<128x128xf32, #tpu.memory_space<vmem>>, vector<128x128xf32>
    %12 = arith.truncf %11 : vector<128x128xf32> to vector<128x128xbf16>
    %cst_8 = arith.constant dense<0.000000e+00> : vector<128x128xf32>
    %13 = tpu.matmul %10, %12, %cst_8 {dimension_numbers = #tpu.dot_dimension_numbers<[1], [0], [0], [1], [0, 0, 1, 1], [], []>} : vector<128x128xbf16>, vector<128x128xbf16>, vector<128x128xf32> -> vector<128x128xf32>
    %c0_9 = arith.constant 0 : index
    %c0_10 = arith.constant 0 : index
    %14 = vector.load %arg5[%c0_9, %c0_10] : memref<1x128xf32, #tpu.memory_space<vmem>>, vector<1x128xf32>
    %15 = vector.broadcast %14 : vector<1x128xf32> to vector<128x128xf32>
    %16 = arith.addf %13, %15 : vector<128x128xf32>
    %cst_11 = arith.constant 0.000000e+00 : f32
    %17 = vector.broadcast %cst_11 : f32 to vector<128x128xf32>
    %18 = arith.maximumf %16, %17 : vector<128x128xf32>
    %19 = arith.truncf %18 : vector<128x128xf32> to vector<128x128xbf16>
    %c0_12 = arith.constant 0 : index
    %c0_13 = arith.constant 0 : index
    %20 = vector.load %arg6[%c0_12, %c0_13] : memref<128x128xf32, #tpu.memory_space<vmem>>, vector<128x128xf32>
    %21 = arith.truncf %20 : vector<128x128xf32> to vector<128x128xbf16>
    %cst_14 = arith.constant dense<0.000000e+00> : vector<128x128xf32>
    %22 = tpu.matmul %19, %21, %cst_14 {dimension_numbers = #tpu.dot_dimension_numbers<[1], [0], [0], [1], [0, 0, 1, 1], [], []>} : vector<128x128xbf16>, vector<128x128xbf16>, vector<128x128xf32> -> vector<128x128xf32>
    %c0_15 = arith.constant 0 : index
    %c0_16 = arith.constant 0 : index
    %23 = vector.load %arg7[%c0_15, %c0_16] : memref<1x128xf32, #tpu.memory_space<vmem>>, vector<1x128xf32>
    %24 = vector.broadcast %23 : vector<1x128xf32> to vector<128x128xf32>
    %25 = arith.addf %22, %24 : vector<128x128xf32>
    %c0_17 = arith.constant 0 : index
    %c0_18 = arith.constant 0 : index
    %26 = vector.load %arg8[%c0_17, %c0_18] : memref<128x128xf32, #tpu.memory_space<vmem>>, vector<128x128xf32>
    tpu.vector_store %arg8[%c0_17, %c0_18], %25 {strides = array<i32>} : memref<128x128xf32, #tpu.memory_space<vmem>>, vector<128x128xf32>,
    return
  }
  func.func @transform_0(%arg0: i32) -> (i32, i32) {
    %c0_i32 = arith.constant 0 : i32
    %c0_i32_0 = arith.constant 0 : i32
    return %arg0, %c0_i32 : i32, i32
  }
  func.func @transform_1(%arg0: i32) -> (i32, i32) {
    %c0_i32 = arith.constant 0 : i32
    %c0_i32_0 = arith.constant 0 : i32
    %c0_i32_1 = arith.constant 0 : i32
    return %c0_i32, %c0_i32_0 : i32, i32
  }
  func.func @transform_2(%arg0: i32) -> (i32, i32) {
    %c0_i32 = arith.constant 0 : i32
    %c0_i32_0 = arith.constant 0 : i32
    %c0_i32_1 = arith.constant 0 : i32
    return %c0_i32, %c0_i32_0 : i32, i32
  }
  func.func @transform_3(%arg0: i32) -> (i32, i32) {
    %c0_i32 = arith.constant 0 : i32
    %c0_i32_0 = arith.constant 0 : i32
    %c0_i32_1 = arith.constant 0 : i32
    return %c0_i32, %c0_i32_0 : i32, i32
  }
  func.func @transform_4(%arg0: i32) -> (i32, i32) {
    %c0_i32 = arith.constant 0 : i32
    %c0_i32_0 = arith.constant 0 : i32
    %c0_i32_1 = arith.constant 0 : i32
    return %c0_i32, %c0_i32_0 : i32, i32
  }
  func.func @transform_5(%arg0: i32) -> (i32, i32) {
    %c0_i32 = arith.constant 0 : i32
    %c0_i32_0 = arith.constant 0 : i32
    %c0_i32_1 = arith.constant 0 : i32
    return %c0_i32, %c0_i32_0 : i32, i32
  }
  func.func @transform_6(%arg0: i32) -> (i32, i32) {
    %c0_i32 = arith.constant 0 : i32
    %c0_i32_0 = arith.constant 0 : i32
    %c0_i32_1 = arith.constant 0 : i32
    return %c0_i32, %c0_i32_0 : i32, i32
  }
  func.func @transform_7(%arg0: i32) -> (i32, i32) {
    %c0_i32 = arith.constant 0 : i32
    %c0_i32_0 = arith.constant 0 : i32
    return %arg0, %c0_i32 : i32, i32
  }
}

</mosaic_0001>

<bundles_post_ra>
// kernel: tpu_custom_call.1
= control target key start
LH: loop header
LB: loop body
LE: loop exit
PB: predicated region body
PF: predicated region fallthrough
CT: control target
= control target key end

     0   :  { %12 = vsyncpa [#allocation3], 0  ;;  %s1798_s0 = inlined_call_operand.hbm [shape: f32[384,128], index: 0, kind: input, shape index: {}]   ;;  %s1799_s1 = inlined_call_operand.hbm [shape: f32[128,128], index: 1, kind: input, shape index: {}]   ;;  %s1800_s2 = inlined_call_operand.vmem [shape: f32[1,128], index: 2, kind: input, shape index: {}]   ;;  %s1801_s3 = inlined_call_operand.hbm [shape: f32[128,128], index: 3, kind: input, shape index: {}]   ;;  %s1802_s4 = inlined_call_operand.vmem [shape: f32[1,128], index: 4, kind: input, shape index: {}]   ;;  %s1803_s5 = inlined_call_operand.hbm [shape: f32[128,128], index: 5, kind: input, shape index: {}]   ;;  %s1804_s6 = inlined_call_operand.vmem [shape: f32[1,128], index: 6, kind: input, shape index: {}]   ;;  %s1805_s7 = inlined_call_operand.hbm [shape: f32[384,128], index: 7, kind: output, shape index: {}]  }
   0x1   :  { %14 = vsyncpa [#allocation3 + $0x1], 0 }
   0x2   :  { %15 = vsyncpa [#allocation6], 0 }
   0x3   :  { %16 = vsyncpa [#allocation9], 0 }
   0x4   :  { %17 = vsyncpa [#allocation4], 0 }
   0x5   :  { %19 = vsyncpa [#allocation4 + $0x1], 0  ;;  %s1437_s24 = smov 0   ;;  %s1439_s25 = smov 0  }
   0x6   :  { %s1441_s26 = smov 0   ;;  %s1443_s27 = smov 0  }
   0x7 LB: > { %s1458_s28 = sadd.s32 4294967295, %s1386_s27   ;;  %s932_s29 = sadd.s32 4294967294, %s1386_s27   ;;  %s1386_s27 = sphi %s1443_s27, %s1830_s27   ;;  %s1382_s26 = sphi %s1441_s26, %s1829_s26   ;;  %s1378_s25 = sphi %s1439_s25, %s1828_s25   ;;  %s1374_s24 = sphi %s1437_s24, %s1827_s24  }
   0x8   : > { %p45_p0 = scmp.ne.s32.totalorder %s1378_s25, %s1374_s24  ;;  %p1806_p1 = scmp.eq.s32.totalorder %s1458_s28, 0 }
   0x9   : > { %p201_p3 = scmp.eq.s32.totalorder %s932_s29, 2  ;;  %p933_p5 = scmp.ge.s32.totalorder %s1386_s27, 1 }
   0xa   : > { %p1467_p4 = por %p1806_p1, %p45_p0  ;;  %p208_p7 = scmp.lt.s32.totalorder %s1386_s27, 4 }
   0xb   : > { %p1472_p6 = por %p201_p3, %p45_p0  ;;  %s1388_s10 = smov [#allocation5]  }
   0xc   : > { %s1810_s30 = scalar_select %p1467_p4, 1, 0 }
   0xd   : > { %s1811_s8 = scalar_select %p1472_p6, 1, 0 }
   0xe   : > { %p1477_p8 = pnand %p933_p5, %p208_p7  ;;  %s220_s11 = sshll.u32 %s1388_s10, 4  ;;  %s1481_s11 = int_to_ptr.vmem [resolvable:$true] %s220_s11 }
   0xf   : > { %1812 = sst [smem:[#allocation15_spill]] %s1811_s8  ;;  %s1389_s13 = smov [#allocation7]  }
  0x10   : > { %s1813_s9 = scalar_select %p1477_p8, 1, 0 }
  0x11   : > { %p1133_p9 = pneg %p1477_p8  ;;  %s236_s14 = sshll.u32 %s1389_s13, 4  ;;  %s1491_s14 = int_to_ptr.vmem [resolvable:$true] %s236_s14 }
  0x12   : > { %s1390_s15 = smov [#allocation8]   ;;  %s1198_s19 = scalar_lea.hbm %s1799_s1, 2048 }
  0x13   : > { %p1487_p10 = pnand %p1133_p9, %p1806_p1  ;;  %s1493_s16 = sshll.u32 %s1390_s15, 4  ;;  %s253_s16 = int_to_ptr.vmem [resolvable:$true] %s1493_s16 }
  0x14   : > { %p1199_p11 = scmp.ne.s32.totalorder %s1799_s1, %s1198_s19  ;;  %p1205_p3 = scmp.lt.u32.totalorder %s1198_s19, %s1799_s1 }
  0x15   : > { %p1503_p12 = pneg %p1487_p10 }
  0x17   : > { %p1201_p13 = pnand %p1503_p12, %p1199_p11 }
  0x19   : > { %p1202_p0 = pneg %p1201_p13 }
  0x1b   : > { %p1207_p5 = pnand %p1205_p3, %p1202_p0 }
  0x1d   : > { %1210 = shalt.err (!%p1207_p5)
}
  0x1e   : > { %s1211_s10 = scalar_lea.vmem %s1481_s11, 2048  ;;  %p1219_p2 = scmp.lt.s32.totalorder %s1481_s11, %s1481_s11 }
  0x1f   : > { %p1212_p7 = scmp.ne.s32.totalorder %s1481_s11, %s1211_s10  ;;  %p1220_p6 = scmp.lt.s32.totalorder %s1211_s10, %s1211_s10 }
  0x21   : > { %p1214_p9 = pnand %p1212_p7, %p1503_p12  ;;  %p1221_p11 = por %p1220_p6, %p1219_p2 }
  0x23   : > { %p1215_p1 = pneg %p1214_p9 }
  0x25   : > { %p1222_p13 = pnand %p1221_p11, %p1215_p1 }
  0x27   : > { %1225 = shalt.err (!%p1222_p13)
}
  0x28   : > { %s1391_s13 = smov 128   ;;  %s1392_s15 = smov 8  }
  0x29   : > { %1136 = dma.hbm_to_vmem [thread:$0]  (!%p1487_p10), %s1799_s1, 2048, %s1481_s11, [#allocation6], %s1391_s13, %s1391_s13, %s1392_s15  }
  0x2a   : > { %s1226_s21 = scalar_lea.hbm %s1801_s3, 2048 }
  0x2b   : > { %p1227_p1 = scmp.ne.s32.totalorder %s1801_s3, %s1226_s21  ;;  %p1233_p0 = scmp.lt.u32.totalorder %s1226_s21, %s1801_s3 }
  0x2d   : > { %p1229_p2 = pnand %p1227_p1, %p1503_p12 }
  0x2f   : > { %p1230_p6 = pneg %p1229_p2 }
  0x31   : > { %p1235_p3 = pnand %p1233_p0, %p1230_p6 }
  0x33   : > { %1238 = shalt.err (!%p1235_p3)
}
  0x34   : > { %s1239_s11 = scalar_lea.vmem %s1491_s14, 2048  ;;  %p1247_p11 = scmp.lt.s32.totalorder %s1491_s14, %s1491_s14 }
  0x35   : > { %p1240_p5 = scmp.ne.s32.totalorder %s1491_s14, %s1239_s11  ;;  %p1248_p13 = scmp.lt.s32.totalorder %s1239_s11, %s1239_s11 }
  0x37   : > { %p1242_p7 = pnand %p1240_p5, %p1503_p12  ;;  %p1249_p1 = por %p1248_p13, %p1247_p11 }
  0x39   : > { %p1243_p9 = pneg %p1242_p7 }
  0x3b   : > { %p1250_p2 = pnand %p1249_p1, %p1243_p9 }
  0x3d   : > { %1253 = shalt.err (!%p1250_p2)
}
  0x3e   : > { %1139 = dma.hbm_to_vmem [thread:$0]  (!%p1487_p10), %s1801_s3, 2048, %s1491_s14, [#allocation6], %s1391_s13, %s1391_s13, %s1392_s15  }
  0x3f   : > { %s1254_s20 = scalar_lea.hbm %s1803_s5, 2048 }
  0x40   : > { %p1255_p6 = scmp.ne.s32.totalorder %s1803_s5, %s1254_s20  ;;  %p1261_p5 = scmp.lt.u32.totalorder %s1254_s20, %s1803_s5 }
  0x42   : > { %p1257_p0 = pnand %p1255_p6, %p1503_p12 }
  0x44   : > { %p1258_p3 = pneg %p1257_p0 }
  0x46   : > { %p1263_p7 = pnand %p1261_p5, %p1258_p3 }
  0x48   : > { %1266 = shalt.err (!%p1263_p7)
}
  0x49   : > { %s1267_s11 = scalar_lea.vmem %s253_s16, 2048  ;;  %p1275_p1 = scmp.lt.s32.totalorder %s253_s16, %s253_s16 }
  0x4a   : > { %p1268_p9 = scmp.ne.s32.totalorder %s253_s16, %s1267_s11  ;;  %p1276_p2 = scmp.lt.s32.totalorder %s1267_s11, %s1267_s11 }
  0x4c   : > { %p1270_p11 = pnand %p1268_p9, %p1503_p12  ;;  %p1277_p4 = por %p1276_p2, %p1275_p1 }
  0x4e   : > { %p1271_p13 = pneg %p1270_p11 }
  0x50   : > { %p1278_p8 = pnand %p1277_p4, %p1271_p13 }
  0x52   : > { %1281 = shalt.err (!%p1278_p8)
}
  0x53   : > { %1142 = dma.hbm_to_vmem [thread:$0]  (!%p1487_p10), %s1803_s5, 2048, %s253_s16, [#allocation9], %s1391_s13, %s1391_s13, %s1392_s15  }
  0x54   : > { %s1576_s22 = sadd.s32 1, %s1386_s27   ;;  %s32_s17 = sadd.s32 1, %s1382_s26 }
  0x55   : > { %s29_s12 = ssub.s32 %s1386_s27, %s1576_s22  ;;  %p39_p8 = scmp.ne.s32.totalorder %s1382_s26, %s1378_s25 }
  0x56   : > { %p30_p4 = scmp.eq.s32.totalorder %s29_s12, 0  ;;  %p40_p12 = scmp.eq.s32.totalorder %s1386_s27, 0 }
  0x57   : > { %p1154_p6 = scmp.lt.s32.totalorder %s1386_s27, 3  ;;  %p1816_p3 = scmp.eq.s32.totalorder %s1458_s28, 2 }
  0x58   : > { %s1586_s18 = scalar_select %p30_p4, %s1382_s26, %s32_s17  }
  0x59   : > { %p41_p0 = por %p40_p12, %p39_p8  ;;  %p1590_p5 = por %p1816_p3, %p39_p8 }
  0x5a   : > { %s269_s20 = sand.u32 1, %s1382_s26   ;;  %s955_s21 = sshll.u32 %s1386_s27, 11 }
  0x5b   : > { %s938_s16 = sshll.u32 %s269_s20, 7  ;;  %s1599_s10 = scalar_lea.hbm %s1798_s0, %s955_s21 }
  0x5c   : > { %s273_s11 = scalar_lea.vmem [#allocation2], %s938_s16  ;;  %p1601_p10 = pnand %p1154_p6, %p41_p0 }
  0x5d   : > { %s280_s14 = sshll.u32 %s273_s11, 4  ;;  %s1607_s12 = scalar_lea.sflag [#allocation3], %s269_s20  ;;  %s1605_s14 = int_to_ptr.vmem [resolvable:$true] %s280_s14 }
  0x5e   : > { %s1282_s17 = scalar_lea.hbm %s1599_s10, 2048  ;;  %p1284_p9 = pneg %p1601_p10 }
  0x5f   : > { %p1283_p7 = scmp.ne.s32.totalorder %s1599_s10, %s1282_s17  ;;  %s1287_s23 = scalar_lea.hbm %s1798_s0, 6144 }
  0x60   : > { %p1288_p1 = scmp.lt.u32.totalorder %s1599_s10, %s1798_s0  ;;  %p1289_p2 = scmp.lt.u32.totalorder %s1287_s23, %s1282_s17 }
  0x61   : > { %p1285_p11 = pnand %p1284_p9, %p1283_p7  ;;  %p1291_p8 = scmp.lt.u32.totalorder %s1282_s17, %s1599_s10 }
  0x62   : > { %p1290_p4 = por %p1289_p2, %p1288_p1 }
  0x63   : > { %p1286_p13 = pneg %p1285_p11 }
  0x64   : > { %p1292_p12 = por %p1291_p8, %p1290_p4 }
  0x66   : > { %p1293_p6 = pnand %p1292_p12, %p1286_p13 }
  0x68   : > { %1296 = shalt.err (!%p1293_p6)
}
  0x69   : > { %s1297_s20 = scalar_lea.vmem %s1605_s14, 2048  ;;  %s1393_s21 = smov [#allocation2]  }
  0x6a   : > { %p1298_p0 = scmp.ne.s32.totalorder %s1605_s14, %s1297_s20  ;;  %s1302_s16 = sshll.u32 %s1393_s21, 4  ;;  %s1303_s16 = int_to_ptr.vmem [resolvable:$false] %s1302_s16 }
  0x6b   : > { %s1304_s29 = scalar_lea.vmem %s1303_s16, 4096  ;;  %p1305_p11 = scmp.lt.s32.totalorder %s1605_s14, %s1303_s16 }
  0x6c   : > { %p1300_p3 = pnand %p1298_p0, %p1284_p9  ;;  %p1306_p1 = scmp.lt.s32.totalorder %s1304_s29, %s1297_s20 }
  0x6e   : > { %p1301_p7 = pneg %p1300_p3  ;;  %p1307_p2 = por %p1306_p1, %p1305_p11 }
  0x70   : > { %p1308_p4 = pnand %p1307_p2, %p1301_p7 }
  0x72   : > { %1311 = shalt.err (!%p1308_p4)
}
  0x73   : > { %1146 = dma.hbm_to_vmem [thread:$0]  (!%p1601_p10), %s1599_s10, 2048, %s1605_s14, %s1607_s12, %s1391_s13, %s1391_s13, %s1392_s15  }
  0x74   : > { %p1819_p9 = scmp.ne.s32.totalorder %s1813_s9, 0 }
  0x75   : > { %s1641_s17 = sand.u32 (!%p1819_p9), 1, %s1378_s25   ;;  %p1820_p13 = scmp.ne.s32.totalorder (!%p1819_p9), %s1810_s30, 0 }
  0x76   : > { %292 = sbr.rel (%p1819_p9) target bundleno = 868 (0x364), region = 48  ;;  %s942_s23 = sshll.u32 (!%p1819_p9), %s1641_s17, 7 }
  0x77   : > { %s295_s11 = scalar_lea.sflag (!%p1819_p9), [#allocation3], %s1641_s17  ;;  %s1647_s8 = scalar_lea.vmem (!%p1819_p9), [#allocation2], %s942_s23 }
  0x7d   : > { %1357 = dma.done.wait (%p1820_p13), %s295_s11, 2048  }
  0x7e   : > { %1359 = vsyncadd (%p1820_p13), %s295_s11, 4294965248  ;;  %p1821_p10 = scmp.eq.s32.totalorder %s1458_s28, 0 }
  0x80   : > { %1361 = dma.done.wait (%p1821_p10), [#allocation6], 4096   ;;  %p1822_p8 = pmov %p1821_p10 }
  0x82   : > { %1363 = vsyncadd (%p1822_p8), [#allocation6], 4294963200  ;;  %p1823_p12 = pmov %p1822_p8 }
  0x83   : > { %p1824_p6 = pmov %p1822_p8 }
  0x84   : > { %1365 = dma.done.wait (%p1823_p12), [#allocation9], 2048  }
  0x85   : > { %1367 = vsyncadd (%p1824_p6), [#allocation9], 4294965248  ;;  %v368_v0 = vld [vmem:[#allocation5] sm:$0xff]  ;;  %v369_v1 = vld [vmem:[#allocation5 + $0x8] sm:$0xff]  ;;  %s1730_s12 = scalar_lea.vmem [#allocation10], %s942_s23  ;;  %s956_s20 = sshll.u32 %s1458_s28, 11 }
  0x86   : > { %v370_v2 = vld [vmem:[#allocation5 + $0x10] sm:$0xff]  ;;  %v384_v3 = vpack.c.bf16 %v369_v1, %v368_v0  ;;  %v371_v4 = vld [vmem:[#allocation5 + $0x18] sm:$0xff]  ;;  %v372_v6 = vld [vmem:[#allocation5 + $0x20] sm:$0xff]  ;;  %s830_s21 = sshll.u32 %s1730_s12, 4  ;;  %s1750_s23 = scalar_lea.hbm %s1805_s7, %s956_s20  ;;  %s1752_s21 = int_to_ptr.vmem [resolvable:$true] %s830_s21 }
  0x87   : > { %v385_v5 = vpack.c.bf16 %v371_v4, %v370_v2  ;;  %v373_v7 = vld [vmem:[#allocation5 + $0x28] sm:$0xff]  ;;  %v344_v9 = vld [vmem:[%s1647_s8] sm:$0xff]  ;;  %v374_v11 = vld [vmem:[#allocation5 + $0x30] sm:$0xff]  ;;  %s817_s28 = scalar_lea.sflag [#allocation4], %s1641_s17  ;;  %s1312_s11 = scalar_lea.vmem %s1752_s21, 2048 }
  0x88   : > { %1005 = vmatprep.subr.bf16.mxu0 %v384_v3  ;;  %v386_v8 = vpack.c.bf16 %v373_v7, %v372_v6  ;;  %v345_v10 = vld [vmem:[%s1647_s8 + $0x8] sm:$0xff]  ;;  %v375_v12 = vld [vmem:[#allocation5 + $0x38] sm:$0xff]  ;;  %v376_v15 = vld [vmem:[#allocation5 + $0x40] sm:$0xff]  ;;  %p1313_p0 = scmp.ne.s32.totalorder %s1752_s21, %s1312_s11 }
  0x89   : > { %1006 = vmatpush3.bf16.msra.mxu0 %v384_v3  ;;  %v360_v13 = vpack.c.bf16 %v345_v10, %v344_v9  ;;  %v387_v14 = vpack.c.bf16 %v375_v12, %v374_v11  ;;  %v377_v16 = vld [vmem:[#allocation5 + $0x48] sm:$0xff]  ;;  %v520_v17 = vld [vmem:[#allocation7] sm:$0xff]  ;;  %v522_v19 = vld [vmem:[#allocation7 + $0x10] sm:$0xff] }
  0x8a   : > { %1007 = vmatprep.subr.bf16.mxu0 %v385_v5  ;;  %v521_v18 = vld [vmem:[#allocation7 + $0x8] sm:$0xff]  ;;  %v523_v20 = vld [vmem:[#allocation7 + $0x18] sm:$0xff]  ;;  %v388_v23 = vpack.c.bf16 %v377_v16, %v376_v15  ;;  %v524_v24 = vld [vmem:[#allocation7 + $0x20] sm:$0xff]  ;;  %p1314_p3 = pnand %p1313_p0, %p1590_p5 }
  0x8b   : > { %1021 = vmatprep.mubr.bf16.mxu0 %v360_v13  ;;  %v536_v21 = vpack.c.bf16 %v521_v18, %v520_v17  ;;  %v537_v22 = vpack.c.bf16 %v523_v20, %v522_v19  ;;  %v525_v25 = vld [vmem:[#allocation7 + $0x28] sm:$0xff]  ;;  %v378_v26 = vld [vmem:[#allocation5 + $0x50] sm:$0xff]  ;;  %v379_v27 = vld [vmem:[#allocation5 + $0x58] sm:$0xff] }
  0x8c   : > { %v538_v28 = vpack.c.bf16 %v525_v25, %v524_v24  ;;  %v389_v29 = vpack.c.bf16 %v379_v27, %v378_v26  ;;  %v526_v30 = vld [vmem:[#allocation7 + $0x30] sm:$0xff]  ;;  %v527_v31 = vld [vmem:[#allocation7 + $0x38] sm:$0xff]  ;;  %v380_v32 = vld [vmem:[#allocation5 + $0x60] sm:$0xff]  ;;  %p1315_p7 = pneg %p1314_p3 }
  0x8d   : > { %1008 = vmatpush3.bf16.msra.mxu0 %v385_v5  ;;  %1037 = vmatprep.subr.bf16.mxu1 %v536_v21  ;;  %v381_v33 = vld [vmem:[#allocation5 + $0x68] sm:$0xff]  ;;  %v539_v34 = vpack.c.bf16 %v527_v31, %v526_v30  ;;  %v528_v36 = vld [vmem:[#allocation7 + $0x40] sm:$0xff]  ;;  %v382_v38 = vld [vmem:[#allocation5 + $0x70] sm:$0xff] }
  0x8e   : > { %1009 = vmatprep.subr.bf16.mxu0 %v386_v8  ;;  %1038 = vmatpush3.bf16.msra.mxu1 %v536_v21  ;;  %v390_v35 = vpack.c.bf16 %v381_v33, %v380_v32  ;;  %v529_v37 = vld [vmem:[#allocation7 + $0x48] sm:$0xff]  ;;  %v383_v39 = vld [vmem:[#allocation5 + $0x78] sm:$0xff]  ;;  %v530_v42 = vld [vmem:[#allocation7 + $0x50] sm:$0xff] }
  0x8f   : > { %1039 = vmatprep.subr.bf16.mxu1 %v537_v22  ;;  %v540_v40 = vpack.c.bf16 %v529_v37, %v528_v36  ;;  %v391_v41 = vpack.c.bf16 %v383_v39, %v382_v38  ;;  %v531_v43 = vld [vmem:[#allocation7 + $0x58] sm:$0xff]  ;;  %v346_v44 = vld [vmem:[%s1647_s8 + $0x10] sm:$0xff]  ;;  %v348_v47 = vld [vmem:[%s1647_s8 + $0x20] sm:$0xff] }
  0x90   : > { %v347_v45 = vld [vmem:[%s1647_s8 + $0x18] sm:$0xff]  ;;  %v541_v46 = vpack.c.bf16 %v531_v43, %v530_v42  ;;  %v349_v48 = vld [vmem:[%s1647_s8 + $0x28] sm:$0xff]  ;;  %v350_v51 = vld [vmem:[%s1647_s8 + $0x30] sm:$0xff] }
  0x91   : > { %1010 = vmatpush3.bf16.msra.mxu0 %v386_v8  ;;  %v361_v49 = vpack.c.bf16 %v347_v45, %v346_v44  ;;  %v362_v50 = vpack.c.bf16 %v349_v48, %v348_v47  ;;  %v351_v52 = vld [vmem:[%s1647_s8 + $0x38] sm:$0xff]  ;;  %v352_v53 = vld [vmem:[%s1647_s8 + $0x40] sm:$0xff]  ;;  %v353_v54 = vld [vmem:[%s1647_s8 + $0x48] sm:$0xff] }
  0x92   : > { %1011 = vmatprep.subr.bf16.mxu0 %v387_v14  ;;  %1040 = vmatpush3.bf16.msra.mxu1 %v537_v22  ;;  %v363_v55 = vpack.c.bf16 %v351_v52, %v350_v51  ;;  %v364_v56 = vpack.c.bf16 %v353_v54, %v352_v53  ;;  %v354_v57 = vld [vmem:[%s1647_s8 + $0x50] sm:$0xff]  ;;  %v355_v58 = vld [vmem:[%s1647_s8 + $0x58] sm:$0xff]  ;;  %v356_v59 = vld [vmem:[%s1647_s8 + $0x60] sm:$0xff] }
  0x93   : > { %1041 = vmatprep.subr.bf16.mxu1 %v538_v28  ;;  %v357_v60 = vld [vmem:[%s1647_s8 + $0x68] sm:$0xff]  ;;  %v365_v61 = vpack.c.bf16 %v355_v58, %v354_v57  ;;  %v358_v63 = vld [vmem:[%s1647_s8 + $0x70] sm:$0xff]  ;;  %v359_v0 = vld [vmem:[%s1647_s8 + $0x78] sm:$0xff]  ;;  %s1394_s8 = smov [#allocation10]  }
  0x94   : > { %v366_v62 = vpack.c.bf16 %v357_v60, %v356_v59  ;;  %v367_v1 = vpack.c.bf16 %v359_v0, %v358_v63  ;;  %v532_v2 = vld [vmem:[#allocation7 + $0x60] sm:$0xff]  ;;  %v533_v3 = vld [vmem:[#allocation7 + $0x68] sm:$0xff]  ;;  %v534_v5 = vld [vmem:[#allocation7 + $0x70] sm:$0xff]  ;;  %s1316_s30 = sshll.u32 %s1394_s8, 4  ;;  %s1317_s30 = int_to_ptr.vmem [resolvable:$false] %s1316_s30 }
  0x95   : > { %1012 = vmatpush3.bf16.msra.mxu0 %v387_v14  ;;  %v542_v4 = vpack.c.bf16 %v533_v3, %v532_v2  ;;  %v535_v6 = vld [vmem:[#allocation7 + $0x78] sm:$0xff]  ;;  %v672_v8 = vld [vmem:[#allocation8] sm:$0xff]  ;;  %v673_v9 = vld [vmem:[#allocation8 + $0x8] sm:$0xff]  ;;  %s1318_s9 = scalar_lea.vmem %s1317_s30, 4096  ;;  %p1319_p11 = scmp.lt.s32.totalorder %s1752_s21, %s1317_s30 }
  0x96   : > { %1013 = vmatprep.subr.bf16.mxu0 %v388_v23  ;;  %1042 = vmatpush3.bf16.msra.mxu1 %v538_v28  ;;  %v543_v7 = vpack.c.bf16 %v535_v6, %v534_v5  ;;  %v674_v10 = vld [vmem:[#allocation8 + $0x10] sm:$0xff]  ;;  %v688_v11 = vpack.c.bf16 %v673_v9, %v672_v8  ;;  %v675_v12 = vld [vmem:[#allocation8 + $0x18] sm:$0xff]  ;;  %v676_v14 = vld [vmem:[#allocation8 + $0x20] sm:$0xff]  ;;  %p1320_p1 = scmp.lt.s32.totalorder %s1318_s9, %s1312_s11 }
  0x97   : > { %1043 = vmatprep.subr.bf16.mxu1 %v539_v34  ;;  %v689_v13 = vpack.c.bf16 %v675_v12, %v674_v10  ;;  %v677_v15 = vld [vmem:[#allocation8 + $0x28] sm:$0xff]  ;;  %v678_v17 = vld [vmem:[#allocation8 + $0x30] sm:$0xff]  ;;  %v679_v18 = vld [vmem:[#allocation8 + $0x38] sm:$0xff] }
  0x98   : > { %v1677_v16 = vpack.c.bf16 %v677_v15, %v676_v14  ;;  %v1680_v19 = vpack.c.bf16 %v679_v18, %v678_v17  ;;  %v680_v20 = vld [vmem:[#allocation8 + $0x40] sm:$0xff]  ;;  %v681_v21 = vld [vmem:[#allocation8 + $0x48] sm:$0xff]  ;;  %v683_v24 = vld [vmem:[#allocation8 + $0x58] sm:$0xff]  ;;  %p1321_p2 = por %p1320_p1, %p1319_p11 }
  0x99   : > { %1014 = vmatpush3.bf16.msra.mxu0 %v388_v23  ;;  %v1684_v22 = vpack.c.bf16 %v681_v21, %v680_v20  ;;  %v682_v23 = vld [vmem:[#allocation8 + $0x50] sm:$0xff]  ;;  %v1696_v26 = vld [vmem:[%s1800_s2] ss:$0 sm:$0xff]  ;;  %v685_v20 = vld [vmem:[#allocation8 + $0x68] sm:$0xff] }
  0x9a   : > { %1015 = vmatprep.subr.bf16.mxu0 %v389_v29  ;;  %1044 = vmatpush3.bf16.msra.mxu1 %v539_v34  ;;  %v1688_v25 = vpack.c.bf16 %v683_v24, %v682_v23  ;;  %v686_v23 = vld [vmem:[#allocation8 + $0x70] sm:$0xff]  ;;  %p1322_p4 = pnand %p1321_p2, %p1315_p7 }
  0x9b   : > { %1045 = vmatprep.subr.bf16.mxu1 %v540_v40 }
  0x9d   : > { %1016 = vmatpush3.bf16.msra.mxu0 %v389_v29 }
  0x9e   : > { %1017 = vmatprep.subr.bf16.mxu0 %v390_v35  ;;  %1046 = vmatpush3.bf16.msra.mxu1 %v540_v40 }
  0x9f   : > { %1047 = vmatprep.subr.bf16.mxu1 %v541_v46 }
  0xa1   : > { %1018 = vmatpush3.bf16.msra.mxu0 %v390_v35 }
  0xa2   : > { %1019 = vmatprep.subr.bf16.mxu0 %v391_v41  ;;  %1048 = vmatpush3.bf16.msra.mxu1 %v541_v46 }
  0xa3   : > { %1049 = vmatprep.subr.bf16.mxu1 %v542_v4 }
  0xa5   : > { %1020 = vmatpush3.bf16.msra.mxu0 %v391_v41 }
  0xa6   : > { %1050 = vmatpush3.bf16.msra.mxu1 %v542_v4  ;;  %1069 = vmatprep.subr.bf16.mxu0 %v688_v11 }
  0xa7   : > { %1051 = vmatprep.subr.bf16.mxu1 %v543_v7 }
  0xa8   : > { %1022 = vmatmul.mubr.bf16.vlgmr.msra.gmra.mrb[0].mxu0 %v361_v49 }
  0xa9   : > { %1025 = vmatprep.mubr.bf16.mxu0 %v362_v50  ;;  %1070 = vmatpush3.bf16.msra.mxu0 %v688_v11 }
  0xaa   : > { %1052 = vmatpush3.bf16.msra.mxu1 %v543_v7  ;;  %1071 = vmatprep.subr.bf16.mxu0 %v689_v13 }
  0xab   : > { %1101 = vmatprep.subr.bf16.mxu1 %v688_v11 }
  0xad   : > { %1072 = vmatpush3.bf16.msra.mxu0 %v689_v13 }
  0xae   : > { %1073 = vmatprep.subr.bf16.mxu0 %v1677_v16 }
  0xb0   : > { %1026 = vmatmul.mubr.bf16.gmra.mrb[4].mxu0 %v363_v55 }
  0xb1   : > { %1029 = vmatprep.mubr.bf16.mxu0 %v364_v56  ;;  %1074 = vmatpush3.bf16.msra.mxu0 %v1677_v16 }
  0xb2   : > { %1075 = vmatprep.subr.bf16.mxu0 %v1680_v19 }
  0xb5   : > { %1076 = vmatpush3.bf16.msra.mxu0 %v1680_v19 }
  0xb6   : > { %1077 = vmatprep.subr.bf16.mxu0 %v1684_v22 }
  0xb8   : > { %1030 = vmatmul.mubr.bf16.gmra.mrb[8].mxu0 %v365_v61 }
  0xb9   : > { %1033 = vmatprep.mubr.bf16.mxu0 %v366_v62  ;;  %1078 = vmatpush3.bf16.msra.mxu0 %v1684_v22 }
  0xba   : > { %1079 = vmatprep.subr.bf16.mxu0 %v1688_v25 }
  0xbd   : > { %1080 = vmatpush3.bf16.msra.mxu0 %v1688_v25 }
  0xc0   : > { %1034 = vmatmul.mubr.bf16.gmra.mrb[12].mxu0 %v367_v1 }
 0x17b   : > { %v1023_v27 = vpop.f32.mrb[0].mxu0 }
 0x17c   : > { %v442_v28 = vadd.f32 %v1023_v27, %v1696_v26  ;;  %v433_v29 = vpop.f32.mrb[1].mxu0 }
 0x17d   : > { %v434_v30 = vadd.f32 %v1696_v26, %v433_v29  ;;  %v1024_v31 = vpop.f32.mrb[2].mxu0 }
 0x17e   : > { %v445_v32 = vadd.f32 %v1024_v31, %v1696_v26  ;;  %v436_v33 = vpop.f32.mrb[3].mxu0  ;;  %v498_v35 = vmax.f32 %v442_v28, 0.0 }
 0x17f   : > { %v437_v34 = vadd.f32 %v1696_v26, %v436_v33  ;;  %v496_v37 = vmax.f32 %v434_v30, 0.0 }
 0x180   : > { %v499_v36 = vmax.f32 %v445_v32, 0.0 }
 0x181   : > { %v497_v38 = vmax.f32 %v437_v34, 0.0 }
 0x182   : > { %v513_v39 = vpack.c.bf16 %v499_v36, %v498_v35 }
 0x183   : > { %v1027_v40 = vpop.f32.mrb[4].mxu0  ;;  %v512_v41 = vpack.c.bf16 %v497_v38, %v496_v37 }
 0x184   : > { %v458_v42 = vadd.f32 %v1027_v40, %v1696_v26  ;;  %v449_v43 = vpop.f32.mrb[5].mxu0 }
 0x185   : > { %v450_v44 = vadd.f32 %v1696_v26, %v449_v43  ;;  %v1028_v45 = vpop.f32.mrb[6].mxu0  ;;  %1053 = vmatprep.mubr.bf16.mxu1 %v512_v41 }
 0x186   : > { %v461_v46 = vadd.f32 %v1028_v45, %v1696_v26  ;;  %v452_v47 = vpop.f32.mrb[7].mxu0  ;;  %1054 = vmatmul.mubr.bf16.vlgmr.msra.gmra.mrb[0].mxu1 %v513_v39  ;;  %v502_v49 = vmax.f32 %v458_v42, 0.0 }
 0x187   : > { %v453_v48 = vadd.f32 %v1696_v26, %v452_v47  ;;  %1109 = vmatpush3.bf16.msra.mxu1 %v688_v11  ;;  %v500_v51 = vmax.f32 %v450_v44, 0.0 }
 0x188   : > { %v503_v50 = vmax.f32 %v461_v46, 0.0  ;;  %1102 = vmatprep.subr.bf16.mxu1 %v689_v13 }
 0x189   : > { %v501_v52 = vmax.f32 %v453_v48, 0.0 }
 0x18a   : > { %v515_v53 = vpack.c.bf16 %v503_v50, %v502_v49 }
 0x18b   : > { %v514_v54 = vpack.c.bf16 %v501_v52, %v500_v51  ;;  %v1031_v55 = vpop.f32.mrb[8].mxu0  ;;  %1110 = vmatpush3.bf16.msra.mxu1 %v689_v13 }
 0x18c   : > { %v474_v56 = vadd.f32 %v1031_v55, %v1696_v26  ;;  %v465_v57 = vpop.f32.mrb[9].mxu0  ;;  %1103 = vmatprep.subr.bf16.mxu1 %v1677_v16 }
 0x18d   : > { %v466_v58 = vadd.f32 %v1696_v26, %v465_v57  ;;  %v1032_v59 = vpop.f32.mrb[10].mxu0  ;;  %1057 = vmatprep.mubr.bf16.mxu1 %v514_v54 }
 0x18e   : > { %v477_v60 = vadd.f32 %v1032_v59, %v1696_v26  ;;  %v468_v61 = vpop.f32.mrb[11].mxu0  ;;  %1058 = vmatmul.mubr.bf16.gmra.mrb[4].mxu1 %v515_v53  ;;  %v506_v63 = vmax.f32 %v474_v56, 0.0 }
 0x18f   : > { %v469_v62 = vadd.f32 %v1696_v26, %v468_v61  ;;  %1111 = vmatpush3.bf16.msra.mxu1 %v1677_v16  ;;  %v504_v1 = vmax.f32 %v466_v58, 0.0 }
 0x190   : > { %v507_v0 = vmax.f32 %v477_v60, 0.0  ;;  %1104 = vmatprep.subr.bf16.mxu1 %v1680_v19 }
 0x191   : > { %v505_v2 = vmax.f32 %v469_v62, 0.0 }
 0x192   : > { %v517_v3 = vpack.c.bf16 %v507_v0, %v506_v63 }
 0x193   : > { %v516_v4 = vpack.c.bf16 %v505_v2, %v504_v1  ;;  %v1035_v5 = vpop.f32.mrb[12].mxu0  ;;  %1112 = vmatpush3.bf16.msra.mxu1 %v1680_v19  ;;  %v684_v19 = vld [vmem:[#allocation8 + $0x60] sm:$0xff] }
 0x194   : > { %v490_v6 = vadd.f32 %v1035_v5, %v1696_v26  ;;  %v481_v7 = vpop.f32.mrb[13].mxu0  ;;  %1105 = vmatprep.subr.bf16.mxu1 %v1684_v22  ;;  %v694_v21 = vpack.c.bf16 %v685_v20, %v684_v19 }
 0x195   : > { %v482_v8 = vadd.f32 %v1696_v26, %v481_v7  ;;  %v1036_v9 = vpop.f32.mrb[14].mxu0  ;;  %1061 = vmatprep.mubr.bf16.mxu1 %v516_v4 }
 0x196   : > { %v493_v10 = vadd.f32 %v1036_v9, %v1696_v26  ;;  %v484_v11 = vpop.f32.mrb[15].mxu0  ;;  %1062 = vmatmul.mubr.bf16.gmra.mrb[8].mxu1 %v517_v3  ;;  %v510_v13 = vmax.f32 %v490_v6, 0.0  ;;  %1081 = vmatprep.subr.bf16.mxu0 %v694_v21 }
 0x197   : > { %v485_v12 = vadd.f32 %v1696_v26, %v484_v11  ;;  %1113 = vmatpush3.bf16.msra.mxu1 %v1684_v22  ;;  %v508_v15 = vmax.f32 %v482_v8, 0.0  ;;  %1082 = vmatpush3.bf16.msra.mxu0 %v694_v21  ;;  %v687_v22 = vld [vmem:[#allocation8 + $0x78] sm:$0xff] }
 0x198   : > { %v511_v14 = vmax.f32 %v493_v10, 0.0  ;;  %1106 = vmatprep.subr.bf16.mxu1 %v1688_v25  ;;  %v695_v24 = vpack.c.bf16 %v687_v22, %v686_v23 }
 0x199   : > { %v509_v16 = vmax.f32 %v485_v12, 0.0 }
 0x19a   : > { %v519_v17 = vpack.c.bf16 %v511_v14, %v510_v13  ;;  %1083 = vmatprep.subr.bf16.mxu0 %v695_v24 }
 0x19b   : > { %v518_v18 = vpack.c.bf16 %v509_v16, %v508_v15  ;;  %1114 = vmatpush3.bf16.msra.mxu1 %v1688_v25  ;;  %1084 = vmatpush3.bf16.msra.mxu0 %v695_v24  ;;  %v948_v25 = vld [vmem:[%s1802_s4] ss:$0 sm:$0xff] }
 0x19c   : > { %1107 = vmatprep.subr.bf16.mxu1 %v694_v21 }
 0x19d   : > { %1065 = vmatprep.mubr.bf16.mxu1 %v518_v18  ;;  %v949_v18 = vld [vmem:[%s1804_s6] ss:$0 sm:$0xff] }
 0x19e   : > { %1066 = vmatmul.mubr.bf16.gmra.mrb[12].mxu1 %v519_v17 }
 0x19f   : > { %1115 = vmatpush3.bf16.msra.mxu1 %v694_v21 }
 0x1a0   : > { %1108 = vmatprep.subr.bf16.mxu1 %v695_v24 }
 0x1a3   : > { %1116 = vmatpush3.bf16.msra.mxu1 %v695_v24 }
 0x259   : > { %v1055_v26 = vpop.f32.mrb[0].mxu1 }
 0x25a   : > { %v594_v27 = vadd.f32 %v1055_v26, %v948_v25  ;;  %v585_v28 = vpop.f32.mrb[1].mxu1 }
 0x25b   : > { %v586_v29 = vadd.f32 %v948_v25, %v585_v28  ;;  %v1056_v30 = vpop.f32.mrb[2].mxu1 }
 0x25c   : > { %v597_v31 = vadd.f32 %v1056_v30, %v948_v25  ;;  %v588_v32 = vpop.f32.mrb[3].mxu1  ;;  %v650_v34 = vmax.f32 %v594_v27, 0.0 }
 0x25d   : > { %v589_v33 = vadd.f32 %v948_v25, %v588_v32  ;;  %v648_v36 = vmax.f32 %v586_v29, 0.0 }
 0x25e   : > { %v651_v35 = vmax.f32 %v597_v31, 0.0 }
 0x25f   : > { %v649_v37 = vmax.f32 %v589_v33, 0.0 }
 0x260   : > { %v665_v38 = vpack.c.bf16 %v651_v35, %v650_v34 }
 0x261   : > { %v664_v39 = vpack.c.bf16 %v649_v37, %v648_v36  ;;  %v1059_v40 = vpop.f32.mrb[4].mxu1 }
 0x262   : > { %v610_v41 = vadd.f32 %v1059_v40, %v948_v25  ;;  %v601_v42 = vpop.f32.mrb[5].mxu1 }
 0x263   : > { %v602_v43 = vadd.f32 %v948_v25, %v601_v42  ;;  %v1060_v44 = vpop.f32.mrb[6].mxu1  ;;  %1085 = vmatprep.mubr.bf16.mxu0 %v664_v39 }
 0x264   : > { %v613_v45 = vadd.f32 %v1060_v44, %v948_v25  ;;  %v604_v46 = vpop.f32.mrb[7].mxu1  ;;  %1086 = vmatmul.mubr.bf16.vlgmr.msra.gmra.mrb[16].mxu0 %v665_v38  ;;  %v654_v48 = vmax.f32 %v610_v41, 0.0 }
 0x265   : > { %v605_v47 = vadd.f32 %v948_v25, %v604_v46  ;;  %v652_v50 = vmax.f32 %v602_v43, 0.0 }
 0x266   : > { %v655_v49 = vmax.f32 %v613_v45, 0.0 }
 0x267   : > { %v653_v51 = vmax.f32 %v605_v47, 0.0 }
 0x268   : > { %v667_v52 = vpack.c.bf16 %v655_v49, %v654_v48 }
 0x269   : > { %v666_v53 = vpack.c.bf16 %v653_v51, %v652_v50  ;;  %v1063_v54 = vpop.f32.mrb[8].mxu1 }
 0x26a   : > { %v626_v55 = vadd.f32 %v1063_v54, %v948_v25  ;;  %v617_v56 = vpop.f32.mrb[9].mxu1 }
 0x26b   : > { %v618_v57 = vadd.f32 %v948_v25, %v617_v56  ;;  %v1064_v58 = vpop.f32.mrb[10].mxu1  ;;  %1089 = vmatprep.mubr.bf16.mxu0 %v666_v53 }
 0x26c   : > { %v629_v59 = vadd.f32 %v1064_v58, %v948_v25  ;;  %v620_v60 = vpop.f32.mrb[11].mxu1  ;;  %1090 = vmatmul.mubr.bf16.gmra.mrb[20].mxu0 %v667_v52  ;;  %v658_v62 = vmax.f32 %v626_v55, 0.0 }
 0x26d   : > { %v621_v61 = vadd.f32 %v948_v25, %v620_v60  ;;  %v656_v0 = vmax.f32 %v618_v57, 0.0 }
 0x26e   : > { %v659_v63 = vmax.f32 %v629_v59, 0.0 }
 0x26f   : > { %v657_v1 = vmax.f32 %v621_v61, 0.0 }
 0x270   : > { %v669_v2 = vpack.c.bf16 %v659_v63, %v658_v62 }
 0x271   : > { %v668_v3 = vpack.c.bf16 %v657_v1, %v656_v0  ;;  %v1067_v4 = vpop.f32.mrb[12].mxu1 }
 0x272   : > { %v642_v5 = vadd.f32 %v1067_v4, %v948_v25  ;;  %v633_v6 = vpop.f32.mrb[13].mxu1 }
 0x273   : > { %v634_v7 = vadd.f32 %v948_v25, %v633_v6  ;;  %v1068_v8 = vpop.f32.mrb[14].mxu1  ;;  %1093 = vmatprep.mubr.bf16.mxu1 %v668_v3 }
 0x274   : > { %v645_v9 = vadd.f32 %v1068_v8, %v948_v25  ;;  %v636_v10 = vpop.f32.mrb[15].mxu1  ;;  %1094 = vmatmul.mubr.bf16.vlgmr.msra.gmra.mrb[16].mxu1 %v669_v2  ;;  %v662_v12 = vmax.f32 %v642_v5, 0.0 }
 0x275   : > { %v637_v11 = vadd.f32 %v948_v25, %v636_v10  ;;  %v660_v14 = vmax.f32 %v634_v7, 0.0 }
 0x276   : > { %v663_v13 = vmax.f32 %v645_v9, 0.0 }
 0x277   : > { %v661_v15 = vmax.f32 %v637_v11, 0.0 }
 0x278   : > { %v671_v16 = vpack.c.bf16 %v663_v13, %v662_v12 }
 0x279   : > { %v670_v17 = vpack.c.bf16 %v661_v15, %v660_v14 }
 0x27b   : > { %1097 = vmatprep.mubr.bf16.mxu1 %v670_v17 }
 0x27c   : > { %1098 = vmatmul.mubr.bf16.gmra.mrb[20].mxu1 %v671_v16 }
 0x337   : > { %v1087_v19 = vpop.f32.mrb[16].mxu0 }
 0x338   : > { %v746_v20 = vadd.f32 %v1087_v19, %v949_v18  ;;  %v737_v21 = vpop.f32.mrb[17].mxu0 }
 0x339   : > { %v738_v23 = vadd.f32 %v949_v18, %v737_v21  ;;  %v1088_v22 = vpop.f32.mrb[18].mxu0 }
 0x33a   : > { %802 = vst [vmem:[%s1730_s12 + $0x10] sm:$0xff] %v746_v20  ;;  %v749_v24 = vadd.f32 %v1088_v22, %v949_v18  ;;  %v740_v25 = vpop.f32.mrb[19].mxu0 }
 0x33b   : > { %800 = vst [vmem:[%s1730_s12] sm:$0xff] %v738_v23  ;;  %v741_v26 = vadd.f32 %v949_v18, %v740_v25 }
 0x33c   : > { %803 = vst [vmem:[%s1730_s12 + $0x18] sm:$0xff] %v749_v24 }
 0x33d   : > { %801 = vst [vmem:[%s1730_s12 + $0x8] sm:$0xff] %v741_v26 }
 0x33f   : > { %v1091_v27 = vpop.f32.mrb[20].mxu0 }
 0x340   : > { %v762_v28 = vadd.f32 %v1091_v27, %v949_v18  ;;  %v753_v29 = vpop.f32.mrb[21].mxu0 }
 0x341   : > { %v754_v30 = vadd.f32 %v949_v18, %v753_v29  ;;  %v1092_v31 = vpop.f32.mrb[22].mxu0 }
 0x342   : > { %806 = vst [vmem:[%s1730_s12 + $0x30] sm:$0xff] %v762_v28  ;;  %v765_v32 = vadd.f32 %v1092_v31, %v949_v18  ;;  %v756_v33 = vpop.f32.mrb[23].mxu0 }
 0x343   : > { %804 = vst [vmem:[%s1730_s12 + $0x20] sm:$0xff] %v754_v30  ;;  %v757_v34 = vadd.f32 %v949_v18, %v756_v33 }
 0x344   : > { %807 = vst [vmem:[%s1730_s12 + $0x38] sm:$0xff] %v765_v32 }
 0x345   : > { %805 = vst [vmem:[%s1730_s12 + $0x28] sm:$0xff] %v757_v34 }
 0x347   : > { %v1095_v35 = vpop.f32.mrb[16].mxu1 }
 0x348   : > { %v778_v36 = vadd.f32 %v1095_v35, %v949_v18  ;;  %v769_v37 = vpop.f32.mrb[17].mxu1 }
 0x349   : > { %v770_v38 = vadd.f32 %v949_v18, %v769_v37  ;;  %v1096_v39 = vpop.f32.mrb[18].mxu1 }
 0x34a   : > { %810 = vst [vmem:[%s1730_s12 + $0x50] sm:$0xff] %v778_v36  ;;  %v781_v40 = vadd.f32 %v1096_v39, %v949_v18  ;;  %v772_v41 = vpop.f32.mrb[19].mxu1 }
 0x34b   : > { %808 = vst [vmem:[%s1730_s12 + $0x40] sm:$0xff] %v770_v38  ;;  %v773_v42 = vadd.f32 %v949_v18, %v772_v41 }
 0x34c   : > { %811 = vst [vmem:[%s1730_s12 + $0x58] sm:$0xff] %v781_v40 }
 0x34d   : > { %809 = vst [vmem:[%s1730_s12 + $0x48] sm:$0xff] %v773_v42 }
 0x34f   : > { %v1099_v43 = vpop.f32.mrb[20].mxu1 }
 0x350   : > { %v794_v44 = vadd.f32 %v1099_v43, %v949_v18  ;;  %v785_v45 = vpop.f32.mrb[21].mxu1 }
 0x351   : > { %v786_v46 = vadd.f32 %v949_v18, %v785_v45  ;;  %v1100_v47 = vpop.f32.mrb[22].mxu1 }
 0x352   : > { %814 = vst [vmem:[%s1730_s12 + $0x70] sm:$0xff] %v794_v44  ;;  %v797_v48 = vadd.f32 %v1100_v47, %v949_v18  ;;  %v788_v49 = vpop.f32.mrb[23].mxu1 }
 0x353   : > { %812 = vst [vmem:[%s1730_s12 + $0x60] sm:$0xff] %v786_v46  ;;  %v789_v50 = vadd.f32 %v949_v18, %v788_v49 }
 0x354   : > { %815 = vst [vmem:[%s1730_s12 + $0x78] sm:$0xff] %v797_v48 }
 0x355   : > { %813 = vst [vmem:[%s1730_s12 + $0x68] sm:$0xff] %v789_v50 }
 0x356   : > { %1325 = shalt.err (!%p1322_p4)
}
 0x357   : > { %s1326_s13 = scalar_lea.hbm %s1750_s23, 2048  ;;  %s1330_s14 = scalar_lea.hbm %s1805_s7, 6144 }
 0x358   : > { %p1327_p9 = scmp.ne.s32.totalorder %s1750_s23, %s1326_s13  ;;  %p1331_p8 = scmp.lt.u32.totalorder %s1750_s23, %s1805_s7 }
 0x359   : > { %p1332_p12 = scmp.lt.u32.totalorder %s1330_s14, %s1326_s13  ;;  %p1334_p0 = scmp.lt.u32.totalorder %s1326_s13, %s1750_s23 }
 0x35a   : > { %p1328_p13 = pnand %p1327_p9, %p1590_p5 }
 0x35b   : > { %p1333_p6 = por %p1332_p12, %p1331_p8 }
 0x35c   : > { %p1329_p10 = pneg %p1328_p13 }
 0x35d   : > { %p1335_p3 = por %p1334_p0, %p1333_p6 }
 0x35f   : > { %p1336_p7 = pnand %p1335_p3, %p1329_p10 }
 0x361   : > { %1339 = shalt.err (!%p1336_p7)
}
 0x362   : > { %s1395_s16 = smov 128   ;;  %s1396_s29 = smov 8  }
 0x363   : > { %1131 = dma.vmem_to_hbm [thread:$0]  (%p1590_p5), %s1752_s21, 2048, %s1750_s23, %s817_s28, %s1395_s16, %s1395_s16, %s1396_s29  }
 0x364 PF: > { %s1825_s11 = sld [smem:[#allocation15_spill]]  ;;  %p1158_p11 = scmp.ge.s32.totalorder %s1386_s27, 2 }
 0x365   : > { %s845_s8 = sand.u32 1, %s1374_s24  }
 0x366   : > { %s846_s30 = scalar_lea.sflag [#allocation4], %s845_s8 }
 0x36a   : > { %p1826_p1 = scmp.ne.s32.totalorder %s1825_s11, 0 }
 0x36c   : > { %p1148_p2 = pnand %p1158_p11, %p1826_p1 }
 0x36e   : > { %1369 = dma.done.wait (!%p1148_p2), %s846_s30, 2048  }
 0x36f   : > { %1371 = vsyncadd (!%p1148_p2), %s846_s30, 4294965248  ;;  %p22_p4 = scmp.ge.s32.totalorder %s1576_s22, 5   ;;  %s1827_s24 = smov %s1378_s25 }
 0x370   : > { %s1828_s25 = smov %s1382_s26  ;;  %s1829_s26 = smov %s1586_s18 }
 0x371   : > { %s1830_s27 = smov %s1576_s22  ;;  %24 = sbr.rel (!%p22_p4) target bundleno = 7 (0x7), region = 105 }
 0x378   :  { %851 = vsyncpa [#allocation3], 1 }
 0x379   :  { %853 = vsyncpa [#allocation3 + $0x1], 1 }
 0x37a   :  { %854 = vsyncpa [#allocation6], 1 }
 0x37b   :  { %855 = vsyncpa [#allocation9], 1 }
 0x37c   :  { %856 = vsyncpa [#allocation4], 1 }
 0x37d   :  { %858 = vsyncpa [#allocation4 + $0x1], 1 }

// kernel: tpu_custom_call.1
= control target key start
LH: loop header
LB: loop body
LE: loop exit
PB: predicated region body
PF: predicated region fallthrough
CT: control target
= control target key end

     0   :  { %12 = vsyncpa [#allocation3], 0  ;;  %s1798_s0 = inlined_call_operand.hbm [shape: f32[384,128], index: 0, kind: input, shape index: {}]   ;;  %s1799_s1 = inlined_call_operand.hbm [shape: f32[128,128], index: 1, kind: input, shape index: {}]   ;;  %s1800_s2 = inlined_call_operand.vmem [shape: f32[1,128], index: 2, kind: input, shape index: {}]   ;;  %s1801_s3 = inlined_call_operand.hbm [shape: f32[128,128], index: 3, kind: input, shape index: {}]   ;;  %s1802_s4 = inlined_call_operand.vmem [shape: f32[1,128], index: 4, kind: input, shape index: {}]   ;;  %s1803_s5 = inlined_call_operand.hbm [shape: f32[128,128], index: 5, kind: input, shape index: {}]   ;;  %s1804_s6 = inlined_call_operand.vmem [shape: f32[1,128], index: 6, kind: input, shape index: {}]   ;;  %s1805_s7 = inlined_call_operand.hbm [shape: f32[384,128], index: 7, kind: output, shape index: {}]  }
   0x1   :  { %14 = vsyncpa [#allocation3 + $0x1], 0 }
   0x2   :  { %15 = vsyncpa [#allocation6], 0 }
   0x3   :  { %16 = vsyncpa [#allocation9], 0 }
   0x4   :  { %17 = vsyncpa [#allocation4], 0 }
   0x5   :  { %19 = vsyncpa [#allocation4 + $0x1], 0  ;;  %s1437_s24 = smov 0   ;;  %s1439_s25 = smov 0  }
   0x6   :  { %s1441_s26 = smov 0   ;;  %s1443_s27 = smov 0  }
   0x7 LB: > { %s1458_s28 = sadd.s32 4294967295, %s1386_s27   ;;  %s932_s29 = sadd.s32 4294967294, %s1386_s27   ;;  %s1386_s27 = sphi %s1443_s27, %s1830_s27   ;;  %s1382_s26 = sphi %s1441_s26, %s1829_s26   ;;  %s1378_s25 = sphi %s1439_s25, %s1828_s25   ;;  %s1374_s24 = sphi %s1437_s24, %s1827_s24  }
   0x8   : > { %p45_p0 = scmp.ne.s32.totalorder %s1378_s25, %s1374_s24  ;;  %p1806_p1 = scmp.eq.s32.totalorder %s1458_s28, 0 }
   0x9   : > { %p201_p3 = scmp.eq.s32.totalorder %s932_s29, 2  ;;  %p933_p5 = scmp.ge.s32.totalorder %s1386_s27, 1 }
   0xa   : > { %p1467_p4 = por %p1806_p1, %p45_p0  ;;  %p208_p7 = scmp.lt.s32.totalorder %s1386_s27, 4 }
   0xb   : > { %p1472_p6 = por %p201_p3, %p45_p0  ;;  %s1388_s10 = smov [#allocation5]  }
   0xc   : > { %s1810_s30 = scalar_select %p1467_p4, 1, 0 }
   0xd   : > { %s1811_s8 = scalar_select %p1472_p6, 1, 0 }
   0xe   : > { %p1477_p8 = pnand %p933_p5, %p208_p7  ;;  %s220_s11 = sshll.u32 %s1388_s10, 4  ;;  %s1481_s11 = int_to_ptr.vmem [resolvable:$true] %s220_s11 }
   0xf   : > { %1812 = sst [smem:[#allocation15_spill]] %s1811_s8  ;;  %s1389_s13 = smov [#allocation7]  }
  0x10   : > { %s1813_s9 = scalar_select %p1477_p8, 1, 0 }
  0x11   : > { %p1133_p9 = pneg %p1477_p8  ;;  %s236_s14 = sshll.u32 %s1389_s13, 4  ;;  %s1491_s14 = int_to_ptr.vmem [resolvable:$true] %s236_s14 }
  0x12   : > { %s1390_s15 = smov [#allocation8]   ;;  %s1198_s19 = scalar_lea.hbm %s1799_s1, 2048 }
  0x13   : > { %p1487_p10 = pnand %p1133_p9, %p1806_p1  ;;  %s1493_s16 = sshll.u32 %s1390_s15, 4  ;;  %s253_s16 = int_to_ptr.vmem [resolvable:$true] %s1493_s16 }
  0x14   : > { %p1199_p11 = scmp.ne.s32.totalorder %s1799_s1, %s1198_s19  ;;  %p1205_p3 = scmp.lt.u32.totalorder %s1198_s19, %s1799_s1 }
  0x15   : > { %p1503_p12 = pneg %p1487_p10 }
  0x17   : > { %p1201_p13 = pnand %p1503_p12, %p1199_p11 }
  0x19   : > { %p1202_p0 = pneg %p1201_p13 }
  0x1b   : > { %p1207_p5 = pnand %p1205_p3, %p1202_p0 }
  0x1d   : > { %1210 = shalt.err (!%p1207_p5)
}
  0x1e   : > { %s1211_s10 = scalar_lea.vmem %s1481_s11, 2048  ;;  %p1219_p2 = scmp.lt.s32.totalorder %s1481_s11, %s1481_s11 }
  0x1f   : > { %p1212_p7 = scmp.ne.s32.totalorder %s1481_s11, %s1211_s10  ;;  %p1220_p6 = scmp.lt.s32.totalorder %s1211_s10, %s1211_s10 }
  0x21   : > { %p1214_p9 = pnand %p1212_p7, %p1503_p12  ;;  %p1221_p11 = por %p1220_p6, %p1219_p2 }
  0x23   : > { %p1215_p1 = pneg %p1214_p9 }
  0x25   : > { %p1222_p13 = pnand %p1221_p11, %p1215_p1 }
  0x27   : > { %1225 = shalt.err (!%p1222_p13)
}
  0x28   : > { %s1391_s13 = smov 128   ;;  %s1392_s15 = smov 8  }
  0x29   : > { %1136 = dma.hbm_to_vmem [thread:$0]  (!%p1487_p10), %s1799_s1, 2048, %s1481_s11, [#allocation6], %s1391_s13, %s1391_s13, %s1392_s15  }
  0x2a   : > { %s1226_s21 = scalar_lea.hbm %s1801_s3, 2048 }
  0x2b   : > { %p1227_p1 = scmp.ne.s32.totalorder %s1801_s3, %s1226_s21  ;;  %p1233_p0 = scmp.lt.u32.totalorder %s1226_s21, %s1801_s3 }
  0x2d   : > { %p1229_p2 = pnand %p1227_p1, %p1503_p12 }
  0x2f   : > { %p1230_p6 = pneg %p1229_p2 }
  0x31   : > { %p1235_p3 = pnand %p1233_p0, %p1230_p6 }
  0x33   : > { %1238 = shalt.err (!%p1235_p3)
}
  0x34   : > { %s1239_s11 = scalar_lea.vmem %s1491_s14, 2048  ;;  %p1247_p11 = scmp.lt.s32.totalorder %s1491_s14, %s1491_s14 }
  0x35   : > { %p1240_p5 = scmp.ne.s32.totalorder %s1491_s14, %s1239_s11  ;;  %p1248_p13 = scmp.lt.s32.totalorder %s1239_s11, %s1239_s11 }
  0x37   : > { %p1242_p7 = pnand %p1240_p5, %p1503_p12  ;;  %p1249_p1 = por %p1248_p13, %p1247_p11 }
  0x39   : > { %p1243_p9 = pneg %p1242_p7 }
  0x3b   : > { %p1250_p2 = pnand %p1249_p1, %p1243_p9 }
  0x3d   : > { %1253 = shalt.err (!%p1250_p2)
}
  0x3e   : > { %1139 = dma.hbm_to_vmem [thread:$0]  (!%p1487_p10), %s1801_s3, 2048, %s1491_s14, [#allocation6], %s1391_s13, %s1391_s13, %s1392_s15  }
  0x3f   : > { %s1254_s20 = scalar_lea.hbm %s1803_s5, 2048 }
  0x40   : > { %p1255_p6 = scmp.ne.s32.totalorder %s1803_s5, %s1254_s20  ;;  %p1261_p5 = scmp.lt.u32.totalorder %s1254_s20, %s1803_s5 }
  0x42   : > { %p1257_p0 = pnand %p1255_p6, %p1503_p12 }
  0x44   : > { %p1258_p3 = pneg %p1257_p0 }
  0x46   : > { %p1263_p7 = pnand %p1261_p5, %p1258_p3 }
  0x48   : > { %1266 = shalt.err (!%p1263_p7)
}
  0x49   : > { %s1267_s11 = scalar_lea.vmem %s253_s16, 2048  ;;  %p1275_p1 = scmp.lt.s32.totalorder %s253_s16, %s253_s16 }
  0x4a   : > { %p1268_p9 = scmp.ne.s32.totalorder %s253_s16, %s1267_s11  ;;  %p1276_p2 = scmp.lt.s32.totalorder %s1267_s11, %s1267_s11 }
  0x4c   : > { %p1270_p11 = pnand %p1268_p9, %p1503_p12  ;;  %p1277_p4 = por %p1276_p2, %p1275_p1 }
  0x4e   : > { %p1271_p13 = pneg %p1270_p11 }
  0x50   : > { %p1278_p8 = pnand %p1277_p4, %p1271_p13 }
  0x52   : > { %1281 = shalt.err (!%p1278_p8)
}
  0x53   : > { %1142 = dma.hbm_to_vmem [thread:$0]  (!%p1487_p10), %s1803_s5, 2048, %s253_s16, [#allocation9], %s1391_s13, %s1391_s13, %s1392_s15  }
  0x54   : > { %s1576_s22 = sadd.s32 1, %s1386_s27   ;;  %s32_s17 = sadd.s32 1, %s1382_s26 }
  0x55   : > { %s29_s12 = ssub.s32 %s1386_s27, %s1576_s22  ;;  %p39_p8 = scmp.ne.s32.totalorder %s1382_s26, %s1378_s25 }
  0x56   : > { %p30_p4 = scmp.eq.s32.totalorder %s29_s12, 0  ;;  %p40_p12 = scmp.eq.s32.totalorder %s1386_s27, 0 }
  0x57   : > { %p1154_p6 = scmp.lt.s32.totalorder %s1386_s27, 3  ;;  %p1816_p3 = scmp.eq.s32.totalorder %s1458_s28, 2 }
  0x58   : > { %s1586_s18 = scalar_select %p30_p4, %s1382_s26, %s32_s17  }
  0x59   : > { %p41_p0 = por %p40_p12, %p39_p8  ;;  %p1590_p5 = por %p1816_p3, %p39_p8 }
  0x5a   : > { %s269_s20 = sand.u32 1, %s1382_s26   ;;  %s955_s21 = sshll.u32 %s1386_s27, 11 }
  0x5b   : > { %s938_s16 = sshll.u32 %s269_s20, 7  ;;  %s1599_s10 = scalar_lea.hbm %s1798_s0, %s955_s21 }
  0x5c   : > { %s273_s11 = scalar_lea.vmem [#allocation2], %s938_s16  ;;  %p1601_p10 = pnand %p1154_p6, %p41_p0 }
  0x5d   : > { %s280_s14 = sshll.u32 %s273_s11, 4  ;;  %s1607_s12 = scalar_lea.sflag [#allocation3], %s269_s20  ;;  %s1605_s14 = int_to_ptr.vmem [resolvable:$true] %s280_s14 }
  0x5e   : > { %s1282_s17 = scalar_lea.hbm %s1599_s10, 2048  ;;  %p1284_p9 = pneg %p1601_p10 }
  0x5f   : > { %p1283_p7 = scmp.ne.s32.totalorder %s1599_s10, %s1282_s17  ;;  %s1287_s23 = scalar_lea.hbm %s1798_s0, 6144 }
  0x60   : > { %p1288_p1 = scmp.lt.u32.totalorder %s1599_s10, %s1798_s0  ;;  %p1289_p2 = scmp.lt.u32.totalorder %s1287_s23, %s1282_s17 }
  0x61   : > { %p1285_p11 = pnand %p1284_p9, %p1283_p7  ;;  %p1291_p8 = scmp.lt.u32.totalorder %s1282_s17, %s1599_s10 }
  0x62   : > { %p1290_p4 = por %p1289_p2, %p1288_p1 }
  0x63   : > { %p1286_p13 = pneg %p1285_p11 }
  0x64   : > { %p1292_p12 = por %p1291_p8, %p1290_p4 }
  0x66   : > { %p1293_p6 = pnand %p1292_p12, %p1286_p13 }
  0x68   : > { %1296 = shalt.err (!%p1293_p6)
}
  0x69   : > { %s1297_s20 = scalar_lea.vmem %s1605_s14, 2048  ;;  %s1393_s21 = smov [#allocation2]  }
  0x6a   : > { %p1298_p0 = scmp.ne.s32.totalorder %s1605_s14, %s1297_s20  ;;  %s1302_s16 = sshll.u32 %s1393_s21, 4  ;;  %s1303_s16 = int_to_ptr.vmem [resolvable:$false] %s1302_s16 }
  0x6b   : > { %s1304_s29 = scalar_lea.vmem %s1303_s16, 4096  ;;  %p1305_p11 = scmp.lt.s32.totalorder %s1605_s14, %s1303_s16 }
  0x6c   : > { %p1300_p3 = pnand %p1298_p0, %p1284_p9  ;;  %p1306_p1 = scmp.lt.s32.totalorder %s1304_s29, %s1297_s20 }
  0x6e   : > { %p1301_p7 = pneg %p1300_p3  ;;  %p1307_p2 = por %p1306_p1, %p1305_p11 }
  0x70   : > { %p1308_p4 = pnand %p1307_p2, %p1301_p7 }
  0x72   : > { %1311 = shalt.err (!%p1308_p4)
}
  0x73   : > { %1146 = dma.hbm_to_vmem [thread:$0]  (!%p1601_p10), %s1599_s10, 2048, %s1605_s14, %s1607_s12, %s1391_s13, %s1391_s13, %s1392_s15  }
  0x74   : > { %p1819_p9 = scmp.ne.s32.totalorder %s1813_s9, 0 }
  0x75   : > { %s1641_s17 = sand.u32 (!%p1819_p9), 1, %s1378_s25   ;;  %p1820_p13 = scmp.ne.s32.totalorder (!%p1819_p9), %s1810_s30, 0 }
  0x76   : > { %292 = sbr.rel (%p1819_p9) target bundleno = 868 (0x364), region = 48  ;;  %s942_s23 = sshll.u32 (!%p1819_p9), %s1641_s17, 7 }
  0x77   : > { %s295_s11 = scalar_lea.sflag (!%p1819_p9), [#allocation3], %s1641_s17  ;;  %s1647_s8 = scalar_lea.vmem (!%p1819_p9), [#allocation2], %s942_s23 }
  0x7d   : > { %1357 = dma.done.wait (%p1820_p13), %s295_s11, 2048  }
  0x7e   : > { %1359 = vsyncadd (%p1820_p13), %s295_s11, 4294965248  ;;  %p1821_p10 = scmp.eq.s32.totalorder %s1458_s28, 0 }
  0x80   : > { %1361 = dma.done.wait (%p1821_p10), [#allocation6], 4096   ;;  %p1822_p8 = pmov %p1821_p10 }
  0x82   : > { %1363 = vsyncadd (%p1822_p8), [#allocation6], 4294963200  ;;  %p1823_p12 = pmov %p1822_p8 }
  0x83   : > { %p1824_p6 = pmov %p1822_p8 }
  0x84   : > { %1365 = dma.done.wait (%p1823_p12), [#allocation9], 2048  }
  0x85   : > { %1367 = vsyncadd (%p1824_p6), [#allocation9], 4294965248  ;;  %v368_v0 = vld [vmem:[#allocation5] sm:$0xff]  ;;  %v369_v1 = vld [vmem:[#allocation5 + $0x8] sm:$0xff]  ;;  %s1730_s12 = scalar_lea.vmem [#allocation10], %s942_s23  ;;  %s956_s20 = sshll.u32 %s1458_s28, 11 }
  0x86   : > { %v370_v2 = vld [vmem:[#allocation5 + $0x10] sm:$0xff]  ;;  %v384_v3 = vpack.c.bf16 %v369_v1, %v368_v0  ;;  %v371_v4 = vld [vmem:[#allocation5 + $0x18] sm:$0xff]  ;;  %v372_v6 = vld [vmem:[#allocation5 + $0x20] sm:$0xff]  ;;  %s830_s21 = sshll.u32 %s1730_s12, 4  ;;  %s1750_s23 = scalar_lea.hbm %s1805_s7, %s956_s20  ;;  %s1752_s21 = int_to_ptr.vmem [resolvable:$true] %s830_s21 }
  0x87   : > { %v385_v5 = vpack.c.bf16 %v371_v4, %v370_v2  ;;  %v373_v7 = vld [vmem:[#allocation5 + $0x28] sm:$0xff]  ;;  %v344_v9 = vld [vmem:[%s1647_s8] sm:$0xff]  ;;  %v374_v11 = vld [vmem:[#allocation5 + $0x30] sm:$0xff]  ;;  %s817_s28 = scalar_lea.sflag [#allocation4], %s1641_s17  ;;  %s1312_s11 = scalar_lea.vmem %s1752_s21, 2048 }
  0x88   : > { %1005 = vmatprep.subr.bf16.mxu0 %v384_v3  ;;  %v386_v8 = vpack.c.bf16 %v373_v7, %v372_v6  ;;  %v345_v10 = vld [vmem:[%s1647_s8 + $0x8] sm:$0xff]  ;;  %v375_v12 = vld [vmem:[#allocation5 + $0x38] sm:$0xff]  ;;  %v376_v15 = vld [vmem:[#allocation5 + $0x40] sm:$0xff]  ;;  %p1313_p0 = scmp.ne.s32.totalorder %s1752_s21, %s1312_s11 }
  0x89   : > { %1006 = vmatpush3.bf16.msra.mxu0 %v384_v3  ;;  %v360_v13 = vpack.c.bf16 %v345_v10, %v344_v9  ;;  %v387_v14 = vpack.c.bf16 %v375_v12, %v374_v11  ;;  %v377_v16 = vld [vmem:[#allocation5 + $0x48] sm:$0xff]  ;;  %v520_v17 = vld [vmem:[#allocation7] sm:$0xff]  ;;  %v522_v19 = vld [vmem:[#allocation7 + $0x10] sm:$0xff] }
  0x8a   : > { %1007 = vmatprep.subr.bf16.mxu0 %v385_v5  ;;  %v521_v18 = vld [vmem:[#allocation7 + $0x8] sm:$0xff]  ;;  %v523_v20 = vld [vmem:[#allocation7 + $0x18] sm:$0xff]  ;;  %v388_v23 = vpack.c.bf16 %v377_v16, %v376_v15  ;;  %v524_v24 = vld [vmem:[#allocation7 + $0x20] sm:$0xff]  ;;  %p1314_p3 = pnand %p1313_p0, %p1590_p5 }
  0x8b   : > { %1021 = vmatprep.mubr.bf16.mxu0 %v360_v13  ;;  %v536_v21 = vpack.c.bf16 %v521_v18, %v520_v17  ;;  %v537_v22 = vpack.c.bf16 %v523_v20, %v522_v19  ;;  %v525_v25 = vld [vmem:[#allocation7 + $0x28] sm:$0xff]  ;;  %v378_v26 = vld [vmem:[#allocation5 + $0x50] sm:$0xff]  ;;  %v379_v27 = vld [vmem:[#allocation5 + $0x58] sm:$0xff] }
  0x8c   : > { %v538_v28 = vpack.c.bf16 %v525_v25, %v524_v24  ;;  %v389_v29 = vpack.c.bf16 %v379_v27, %v378_v26  ;;  %v526_v30 = vld [vmem:[#allocation7 + $0x30] sm:$0xff]  ;;  %v527_v31 = vld [vmem:[#allocation7 + $0x38] sm:$0xff]  ;;  %v380_v32 = vld [vmem:[#allocation5 + $0x60] sm:$0xff]  ;;  %p1315_p7 = pneg %p1314_p3 }
  0x8d   : > { %1008 = vmatpush3.bf16.msra.mxu0 %v385_v5  ;;  %1037 = vmatprep.subr.bf16.mxu1 %v536_v21  ;;  %v381_v33 = vld [vmem:[#allocation5 + $0x68] sm:$0xff]  ;;  %v539_v34 = vpack.c.bf16 %v527_v31, %v526_v30  ;;  %v528_v36 = vld [vmem:[#allocation7 + $0x40] sm:$0xff]  ;;  %v382_v38 = vld [vmem:[#allocation5 + $0x70] sm:$0xff] }
  0x8e   : > { %1009 = vmatprep.subr.bf16.mxu0 %v386_v8  ;;  %1038 = vmatpush3.bf16.msra.mxu1 %v536_v21  ;;  %v390_v35 = vpack.c.bf16 %v381_v33, %v380_v32  ;;  %v529_v37 = vld [vmem:[#allocation7 + $0x48] sm:$0xff]  ;;  %v383_v39 = vld [vmem:[#allocation5 + $0x78] sm:$0xff]  ;;  %v530_v42 = vld [vmem:[#allocation7 + $0x50] sm:$0xff] }
  0x8f   : > { %1039 = vmatprep.subr.bf16.mxu1 %v537_v22  ;;  %v540_v40 = vpack.c.bf16 %v529_v37, %v528_v36  ;;  %v391_v41 = vpack.c.bf16 %v383_v39, %v382_v38  ;;  %v531_v43 = vld [vmem:[#allocation7 + $0x58] sm:$0xff]  ;;  %v346_v44 = vld [vmem:[%s1647_s8 + $0x10] sm:$0xff]  ;;  %v348_v47 = vld [vmem:[%s1647_s8 + $0x20] sm:$0xff] }
  0x90   : > { %v347_v45 = vld [vmem:[%s1647_s8 + $0x18] sm:$0xff]  ;;  %v541_v46 = vpack.c.bf16 %v531_v43, %v530_v42  ;;  %v349_v48 = vld [vmem:[%s1647_s8 + $0x28] sm:$0xff]  ;;  %v350_v51 = vld [vmem:[%s1647_s8 + $0x30] sm:$0xff] }
  0x91   : > { %1010 = vmatpush3.bf16.msra.mxu0 %v386_v8  ;;  %v361_v49 = vpack.c.bf16 %v347_v45, %v346_v44  ;;  %v362_v50 = vpack.c.bf16 %v349_v48, %v348_v47  ;;  %v351_v52 = vld [vmem:[%s1647_s8 + $0x38] sm:$0xff]  ;;  %v352_v53 = vld [vmem:[%s1647_s8 + $0x40] sm:$0xff]  ;;  %v353_v54 = vld [vmem:[%s1647_s8 + $0x48] sm:$0xff] }
  0x92   : > { %1011 = vmatprep.subr.bf16.mxu0 %v387_v14  ;;  %1040 = vmatpush3.bf16.msra.mxu1 %v537_v22  ;;  %v363_v55 = vpack.c.bf16 %v351_v52, %v350_v51  ;;  %v364_v56 = vpack.c.bf16 %v353_v54, %v352_v53  ;;  %v354_v57 = vld [vmem:[%s1647_s8 + $0x50] sm:$0xff]  ;;  %v355_v58 = vld [vmem:[%s1647_s8 + $0x58] sm:$0xff]  ;;  %v356_v59 = vld [vmem:[%s1647_s8 + $0x60] sm:$0xff] }
  0x93   : > { %1041 = vmatprep.subr.bf16.mxu1 %v538_v28  ;;  %v357_v60 = vld [vmem:[%s1647_s8 + $0x68] sm:$0xff]  ;;  %v365_v61 = vpack.c.bf16 %v355_v58, %v354_v57  ;;  %v358_v63 = vld [vmem:[%s1647_s8 + $0x70] sm:$0xff]  ;;  %v359_v0 = vld [vmem:[%s1647_s8 + $0x78] sm:$0xff]  ;;  %s1394_s8 = smov [#allocation10]  }
  0x94   : > { %v366_v62 = vpack.c.bf16 %v357_v60, %v356_v59  ;;  %v367_v1 = vpack.c.bf16 %v359_v0, %v358_v63  ;;  %v532_v2 = vld [vmem:[#allocation7 + $0x60] sm:$0xff]  ;;  %v533_v3 = vld [vmem:[#allocation7 + $0x68] sm:$0xff]  ;;  %v534_v5 = vld [vmem:[#allocation7 + $0x70] sm:$0xff]  ;;  %s1316_s30 = sshll.u32 %s1394_s8, 4  ;;  %s1317_s30 = int_to_ptr.vmem [resolvable:$false] %s1316_s30 }
  0x95   : > { %1012 = vmatpush3.bf16.msra.mxu0 %v387_v14  ;;  %v542_v4 = vpack.c.bf16 %v533_v3, %v532_v2  ;;  %v535_v6 = vld [vmem:[#allocation7 + $0x78] sm:$0xff]  ;;  %v672_v8 = vld [vmem:[#allocation8] sm:$0xff]  ;;  %v673_v9 = vld [vmem:[#allocation8 + $0x8] sm:$0xff]  ;;  %s1318_s9 = scalar_lea.vmem %s1317_s30, 4096  ;;  %p1319_p11 = scmp.lt.s32.totalorder %s1752_s21, %s1317_s30 }
  0x96   : > { %1013 = vmatprep.subr.bf16.mxu0 %v388_v23  ;;  %1042 = vmatpush3.bf16.msra.mxu1 %v538_v28  ;;  %v543_v7 = vpack.c.bf16 %v535_v6, %v534_v5  ;;  %v674_v10 = vld [vmem:[#allocation8 + $0x10] sm:$0xff]  ;;  %v688_v11 = vpack.c.bf16 %v673_v9, %v672_v8  ;;  %v675_v12 = vld [vmem:[#allocation8 + $0x18] sm:$0xff]  ;;  %v676_v14 = vld [vmem:[#allocation8 + $0x20] sm:$0xff]  ;;  %p1320_p1 = scmp.lt.s32.totalorder %s1318_s9, %s1312_s11 }
  0x97   : > { %1043 = vmatprep.subr.bf16.mxu1 %v539_v34  ;;  %v689_v13 = vpack.c.bf16 %v675_v12, %v674_v10  ;;  %v677_v15 = vld [vmem:[#allocation8 + $0x28] sm:$0xff]  ;;  %v678_v17 = vld [vmem:[#allocation8 + $0x30] sm:$0xff]  ;;  %v679_v18 = vld [vmem:[#allocation8 + $0x38] sm:$0xff] }
  0x98   : > { %v1677_v16 = vpack.c.bf16 %v677_v15, %v676_v14  ;;  %v1680_v19 = vpack.c.bf16 %v679_v18, %v678_v17  ;;  %v680_v20 = vld [vmem:[#allocation8 + $0x40] sm:$0xff]  ;;  %v681_v21 = vld [vmem:[#allocation8 + $0x48] sm:$0xff]  ;;  %v683_v24 = vld [vmem:[#allocation8 + $0x58] sm:$0xff]  ;;  %p1321_p2 = por %p1320_p1, %p1319_p11 }
  0x99   : > { %1014 = vmatpush3.bf16.msra.mxu0 %v388_v23  ;;  %v1684_v22 = vpack.c.bf16 %v681_v21, %v680_v20  ;;  %v682_v23 = vld [vmem:[#allocation8 + $0x50] sm:$0xff]  ;;  %v1696_v26 = vld [vmem:[%s1800_s2] ss:$0 sm:$0xff]  ;;  %v685_v20 = vld [vmem:[#allocation8 + $0x68] sm:$0xff] }
  0x9a   : > { %1015 = vmatprep.subr.bf16.mxu0 %v389_v29  ;;  %1044 = vmatpush3.bf16.msra.mxu1 %v539_v34  ;;  %v1688_v25 = vpack.c.bf16 %v683_v24, %v682_v23  ;;  %v686_v23 = vld [vmem:[#allocation8 + $0x70] sm:$0xff]  ;;  %p1322_p4 = pnand %p1321_p2, %p1315_p7 }
  0x9b   : > { %1045 = vmatprep.subr.bf16.mxu1 %v540_v40 }
  0x9d   : > { %1016 = vmatpush3.bf16.msra.mxu0 %v389_v29 }
  0x9e   : > { %1017 = vmatprep.subr.bf16.mxu0 %v390_v35  ;;  %1046 = vmatpush3.bf16.msra.mxu1 %v540_v40 }
  0x9f   : > { %1047 = vmatprep.subr.bf16.mxu1 %v541_v46 }
  0xa1   : > { %1018 = vmatpush3.bf16.msra.mxu0 %v390_v35 }
  0xa2   : > { %1019 = vmatprep.subr.bf16.mxu0 %v391_v41  ;;  %1048 = vmatpush3.bf16.msra.mxu1 %v541_v46 }
  0xa3   : > { %1049 = vmatprep.subr.bf16.mxu1 %v542_v4 }
  0xa5   : > { %1020 = vmatpush3.bf16.msra.mxu0 %v391_v41 }
  0xa6   : > { %1050 = vmatpush3.bf16.msra.mxu1 %v542_v4  ;;  %1069 = vmatprep.subr.bf16.mxu0 %v688_v11 }
  0xa7   : > { %1051 = vmatprep.subr.bf16.mxu1 %v543_v7 }
  0xa8   : > { %1022 = vmatmul.mubr.bf16.vlgmr.msra.gmra.mrb[0].mxu0 %v361_v49 }
  0xa9   : > { %1025 = vmatprep.mubr.bf16.mxu0 %v362_v50  ;;  %1070 = vmatpush3.bf16.msra.mxu0 %v688_v11 }
  0xaa   : > { %1052 = vmatpush3.bf16.msra.mxu1 %v543_v7  ;;  %1071 = vmatprep.subr.bf16.mxu0 %v689_v13 }
  0xab   : > { %1101 = vmatprep.subr.bf16.mxu1 %v688_v11 }
  0xad   : > { %1072 = vmatpush3.bf16.msra.mxu0 %v689_v13 }
  0xae   : > { %1073 = vmatprep.subr.bf16.mxu0 %v1677_v16 }
  0xb0   : > { %1026 = vmatmul.mubr.bf16.gmra.mrb[4].mxu0 %v363_v55 }
  0xb1   : > { %1029 = vmatprep.mubr.bf16.mxu0 %v364_v56  ;;  %1074 = vmatpush3.bf16.msra.mxu0 %v1677_v16 }
  0xb2   : > { %1075 = vmatprep.subr.bf16.mxu0 %v1680_v19 }
  0xb5   : > { %1076 = vmatpush3.bf16.msra.mxu0 %v1680_v19 }
  0xb6   : > { %1077 = vmatprep.subr.bf16.mxu0 %v1684_v22 }
  0xb8   : > { %1030 = vmatmul.mubr.bf16.gmra.mrb[8].mxu0 %v365_v61 }
  0xb9   : > { %1033 = vmatprep.mubr.bf16.mxu0 %v366_v62  ;;  %1078 = vmatpush3.bf16.msra.mxu0 %v1684_v22 }
  0xba   : > { %1079 = vmatprep.subr.bf16.mxu0 %v1688_v25 }
  0xbd   : > { %1080 = vmatpush3.bf16.msra.mxu0 %v1688_v25 }
  0xc0   : > { %1034 = vmatmul.mubr.bf16.gmra.mrb[12].mxu0 %v367_v1 }
 0x17b   : > { %v1023_v27 = vpop.f32.mrb[0].mxu0 }
 0x17c   : > { %v442_v28 = vadd.f32 %v1023_v27, %v1696_v26  ;;  %v433_v29 = vpop.f32.mrb[1].mxu0 }
 0x17d   : > { %v434_v30 = vadd.f32 %v1696_v26, %v433_v29  ;;  %v1024_v31 = vpop.f32.mrb[2].mxu0 }
 0x17e   : > { %v445_v32 = vadd.f32 %v1024_v31, %v1696_v26  ;;  %v436_v33 = vpop.f32.mrb[3].mxu0  ;;  %v498_v35 = vmax.f32 %v442_v28, 0.0 }
 0x17f   : > { %v437_v34 = vadd.f32 %v1696_v26, %v436_v33  ;;  %v496_v37 = vmax.f32 %v434_v30, 0.0 }
 0x180   : > { %v499_v36 = vmax.f32 %v445_v32, 0.0 }
 0x181   : > { %v497_v38 = vmax.f32 %v437_v34, 0.0 }
 0x182   : > { %v513_v39 = vpack.c.bf16 %v499_v36, %v498_v35 }
 0x183   : > { %v1027_v40 = vpop.f32.mrb[4].mxu0  ;;  %v512_v41 = vpack.c.bf16 %v497_v38, %v496_v37 }
 0x184   : > { %v458_v42 = vadd.f32 %v1027_v40, %v1696_v26  ;;  %v449_v43 = vpop.f32.mrb[5].mxu0 }
 0x185   : > { %v450_v44 = vadd.f32 %v1696_v26, %v449_v43  ;;  %v1028_v45 = vpop.f32.mrb[6].mxu0  ;;  %1053 = vmatprep.mubr.bf16.mxu1 %v512_v41 }
 0x186   : > { %v461_v46 = vadd.f32 %v1028_v45, %v1696_v26  ;;  %v452_v47 = vpop.f32.mrb[7].mxu0  ;;  %1054 = vmatmul.mubr.bf16.vlgmr.msra.gmra.mrb[0].mxu1 %v513_v39  ;;  %v502_v49 = vmax.f32 %v458_v42, 0.0 }
 0x187   : > { %v453_v48 = vadd.f32 %v1696_v26, %v452_v47  ;;  %1109 = vmatpush3.bf16.msra.mxu1 %v688_v11  ;;  %v500_v51 = vmax.f32 %v450_v44, 0.0 }
 0x188   : > { %v503_v50 = vmax.f32 %v461_v46, 0.0  ;;  %1102 = vmatprep.subr.bf16.mxu1 %v689_v13 }
 0x189   : > { %v501_v52 = vmax.f32 %v453_v48, 0.0 }
 0x18a   : > { %v515_v53 = vpack.c.bf16 %v503_v50, %v502_v49 }
 0x18b   : > { %v514_v54 = vpack.c.bf16 %v501_v52, %v500_v51  ;;  %v1031_v55 = vpop.f32.mrb[8].mxu0  ;;  %1110 = vmatpush3.bf16.msra.mxu1 %v689_v13 }
 0x18c   : > { %v474_v56 = vadd.f32 %v1031_v55, %v1696_v26  ;;  %v465_v57 = vpop.f32.mrb[9].mxu0  ;;  %1103 = vmatprep.subr.bf16.mxu1 %v1677_v16 }
 0x18d   : > { %v466_v58 = vadd.f32 %v1696_v26, %v465_v57  ;;  %v1032_v59 = vpop.f32.mrb[10].mxu0  ;;  %1057 = vmatprep.mubr.bf16.mxu1 %v514_v54 }
 0x18e   : > { %v477_v60 = vadd.f32 %v1032_v59, %v1696_v26  ;;  %v468_v61 = vpop.f32.mrb[11].mxu0  ;;  %1058 = vmatmul.mubr.bf16.gmra.mrb[4].mxu1 %v515_v53  ;;  %v506_v63 = vmax.f32 %v474_v56, 0.0 }
 0x18f   : > { %v469_v62 = vadd.f32 %v1696_v26, %v468_v61  ;;  %1111 = vmatpush3.bf16.msra.mxu1 %v1677_v16  ;;  %v504_v1 = vmax.f32 %v466_v58, 0.0 }
 0x190   : > { %v507_v0 = vmax.f32 %v477_v60, 0.0  ;;  %1104 = vmatprep.subr.bf16.mxu1 %v1680_v19 }
 0x191   : > { %v505_v2 = vmax.f32 %v469_v62, 0.0 }
 0x192   : > { %v517_v3 = vpack.c.bf16 %v507_v0, %v506_v63 }
 0x193   : > { %v516_v4 = vpack.c.bf16 %v505_v2, %v504_v1  ;;  %v1035_v5 = vpop.f32.mrb[12].mxu0  ;;  %1112 = vmatpush3.bf16.msra.mxu1 %v1680_v19  ;;  %v684_v19 = vld [vmem:[#allocation8 + $0x60] sm:$0xff] }
 0x194   : > { %v490_v6 = vadd.f32 %v1035_v5, %v1696_v26  ;;  %v481_v7 = vpop.f32.mrb[13].mxu0  ;;  %1105 = vmatprep.subr.bf16.mxu1 %v1684_v22  ;;  %v694_v21 = vpack.c.bf16 %v685_v20, %v684_v19 }
 0x195   : > { %v482_v8 = vadd.f32 %v1696_v26, %v481_v7  ;;  %v1036_v9 = vpop.f32.mrb[14].mxu0  ;;  %1061 = vmatprep.mubr.bf16.mxu1 %v516_v4 }
 0x196   : > { %v493_v10 = vadd.f32 %v1036_v9, %v1696_v26  ;;  %v484_v11 = vpop.f32.mrb[15].mxu0  ;;  %1062 = vmatmul.mubr.bf16.gmra.mrb[8].mxu1 %v517_v3  ;;  %v510_v13 = vmax.f32 %v490_v6, 0.0  ;;  %1081 = vmatprep.subr.bf16.mxu0 %v694_v21 }
 0x197   : > { %v485_v12 = vadd.f32 %v1696_v26, %v484_v11  ;;  %1113 = vmatpush3.bf16.msra.mxu1 %v1684_v22  ;;  %v508_v15 = vmax.f32 %v482_v8, 0.0  ;;  %1082 = vmatpush3.bf16.msra.mxu0 %v694_v21  ;;  %v687_v22 = vld [vmem:[#allocation8 + $0x78] sm:$0xff] }
 0x198   : > { %v511_v14 = vmax.f32 %v493_v10, 0.0  ;;  %1106 = vmatprep.subr.bf16.mxu1 %v1688_v25  ;;  %v695_v24 = vpack.c.bf16 %v687_v22, %v686_v23 }
 0x199   : > { %v509_v16 = vmax.f32 %v485_v12, 0.0 }
 0x19a   : > { %v519_v17 = vpack.c.bf16 %v511_v14, %v510_v13  ;;  %1083 = vmatprep.subr.bf16.mxu0 %v695_v24 }
 0x19b   : > { %v518_v18 = vpack.c.bf16 %v509_v16, %v508_v15  ;;  %1114 = vmatpush3.bf16.msra.mxu1 %v1688_v25  ;;  %1084 = vmatpush3.bf16.msra.mxu0 %v695_v24  ;;  %v948_v25 = vld [vmem:[%s1802_s4] ss:$0 sm:$0xff] }
 0x19c   : > { %1107 = vmatprep.subr.bf16.mxu1 %v694_v21 }
 0x19d   : > { %1065 = vmatprep.mubr.bf16.mxu1 %v518_v18  ;;  %v949_v18 = vld [vmem:[%s1804_s6] ss:$0 sm:$0xff] }
 0x19e   : > { %1066 = vmatmul.mubr.bf16.gmra.mrb[12].mxu1 %v519_v17 }
 0x19f   : > { %1115 = vmatpush3.bf16.msra.mxu1 %v694_v21 }
 0x1a0   : > { %1108 = vmatprep.subr.bf16.mxu1 %v695_v24 }
 0x1a3   : > { %1116 = vmatpush3.bf16.msra.mxu1 %v695_v24 }
 0x259   : > { %v1055_v26 = vpop.f32.mrb[0].mxu1 }
 0x25a   : > { %v594_v27 = vadd.f32 %v1055_v26, %v948_v25  ;;  %v585_v28 = vpop.f32.mrb[1].mxu1 }
 0x25b   : > { %v586_v29 = vadd.f32 %v948_v25, %v585_v28  ;;  %v1056_v30 = vpop.f32.mrb[2].mxu1 }
 0x25c   : > { %v597_v31 = vadd.f32 %v1056_v30, %v948_v25  ;;  %v588_v32 = vpop.f32.mrb[3].mxu1  ;;  %v650_v34 = vmax.f32 %v594_v27, 0.0 }
 0x25d   : > { %v589_v33 = vadd.f32 %v948_v25, %v588_v32  ;;  %v648_v36 = vmax.f32 %v586_v29, 0.0 }
 0x25e   : > { %v651_v35 = vmax.f32 %v597_v31, 0.0 }
 0x25f   : > { %v649_v37 = vmax.f32 %v589_v33, 0.0 }
 0x260   : > { %v665_v38 = vpack.c.bf16 %v651_v35, %v650_v34 }
 0x261   : > { %v664_v39 = vpack.c.bf16 %v649_v37, %v648_v36  ;;  %v1059_v40 = vpop.f32.mrb[4].mxu1 }
 0x262   : > { %v610_v41 = vadd.f32 %v1059_v40, %v948_v25  ;;  %v601_v42 = vpop.f32.mrb[5].mxu1 }
 0x263   : > { %v602_v43 = vadd.f32 %v948_v25, %v601_v42  ;;  %v1060_v44 = vpop.f32.mrb[6].mxu1  ;;  %1085 = vmatprep.mubr.bf16.mxu0 %v664_v39 }
 0x264   : > { %v613_v45 = vadd.f32 %v1060_v44, %v948_v25  ;;  %v604_v46 = vpop.f32.mrb[7].mxu1  ;;  %1086 = vmatmul.mubr.bf16.vlgmr.msra.gmra.mrb[16].mxu0 %v665_v38  ;;  %v654_v48 = vmax.f32 %v610_v41, 0.0 }
 0x265   : > { %v605_v47 = vadd.f32 %v948_v25, %v604_v46  ;;  %v652_v50 = vmax.f32 %v602_v43, 0.0 }
 0x266   : > { %v655_v49 = vmax.f32 %v613_v45, 0.0 }
 0x267   : > { %v653_v51 = vmax.f32 %v605_v47, 0.0 }
 0x268   : > { %v667_v52 = vpack.c.bf16 %v655_v49, %v654_v48 }
 0x269   : > { %v666_v53 = vpack.c.bf16 %v653_v51, %v652_v50  ;;  %v1063_v54 = vpop.f32.mrb[8].mxu1 }
 0x26a   : > { %v626_v55 = vadd.f32 %v1063_v54, %v948_v25  ;;  %v617_v56 = vpop.f32.mrb[9].mxu1 }
 0x26b   : > { %v618_v57 = vadd.f32 %v948_v25, %v617_v56  ;;  %v1064_v58 = vpop.f32.mrb[10].mxu1  ;;  %1089 = vmatprep.mubr.bf16.mxu0 %v666_v53 }
 0x26c   : > { %v629_v59 = vadd.f32 %v1064_v58, %v948_v25  ;;  %v620_v60 = vpop.f32.mrb[11].mxu1  ;;  %1090 = vmatmul.mubr.bf16.gmra.mrb[20].mxu0 %v667_v52  ;;  %v658_v62 = vmax.f32 %v626_v55, 0.0 }
 0x26d   : > { %v621_v61 = vadd.f32 %v948_v25, %v620_v60  ;;  %v656_v0 = vmax.f32 %v618_v57, 0.0 }
 0x26e   : > { %v659_v63 = vmax.f32 %v629_v59, 0.0 }
 0x26f   : > { %v657_v1 = vmax.f32 %v621_v61, 0.0 }
 0x270   : > { %v669_v2 = vpack.c.bf16 %v659_v63, %v658_v62 }
 0x271   : > { %v668_v3 = vpack.c.bf16 %v657_v1, %v656_v0  ;;  %v1067_v4 = vpop.f32.mrb[12].mxu1 }
 0x272   : > { %v642_v5 = vadd.f32 %v1067_v4, %v948_v25  ;;  %v633_v6 = vpop.f32.mrb[13].mxu1 }
 0x273   : > { %v634_v7 = vadd.f32 %v948_v25, %v633_v6  ;;  %v1068_v8 = vpop.f32.mrb[14].mxu1  ;;  %1093 = vmatprep.mubr.bf16.mxu1 %v668_v3 }
 0x274   : > { %v645_v9 = vadd.f32 %v1068_v8, %v948_v25  ;;  %v636_v10 = vpop.f32.mrb[15].mxu1  ;;  %1094 = vmatmul.mubr.bf16.vlgmr.msra.gmra.mrb[16].mxu1 %v669_v2  ;;  %v662_v12 = vmax.f32 %v642_v5, 0.0 }
 0x275   : > { %v637_v11 = vadd.f32 %v948_v25, %v636_v10  ;;  %v660_v14 = vmax.f32 %v634_v7, 0.0 }
 0x276   : > { %v663_v13 = vmax.f32 %v645_v9, 0.0 }
 0x277   : > { %v661_v15 = vmax.f32 %v637_v11, 0.0 }
 0x278   : > { %v671_v16 = vpack.c.bf16 %v663_v13, %v662_v12 }
 0x279   : > { %v670_v17 = vpack.c.bf16 %v661_v15, %v660_v14 }
 0x27b   : > { %1097 = vmatprep.mubr.bf16.mxu1 %v670_v17 }
 0x27c   : > { %1098 = vmatmul.mubr.bf16.gmra.mrb[20].mxu1 %v671_v16 }
 0x337   : > { %v1087_v19 = vpop.f32.mrb[16].mxu0 }
 0x338   : > { %v746_v20 = vadd.f32 %v1087_v19, %v949_v18  ;;  %v737_v21 = vpop.f32.mrb[17].mxu0 }
 0x339   : > { %v738_v23 = vadd.f32 %v949_v18, %v737_v21  ;;  %v1088_v22 = vpop.f32.mrb[18].mxu0 }
 0x33a   : > { %802 = vst [vmem:[%s1730_s12 + $0x10] sm:$0xff] %v746_v20  ;;  %v749_v24 = vadd.f32 %v1088_v22, %v949_v18  ;;  %v740_v25 = vpop.f32.mrb[19].mxu0 }
 0x33b   : > { %800 = vst [vmem:[%s1730_s12] sm:$0xff] %v738_v23  ;;  %v741_v26 = vadd.f32 %v949_v18, %v740_v25 }
 0x33c   : > { %803 = vst [vmem:[%s1730_s12 + $0x18] sm:$0xff] %v749_v24 }
 0x33d   : > { %801 = vst [vmem:[%s1730_s12 + $0x8] sm:$0xff] %v741_v26 }
 0x33f   : > { %v1091_v27 = vpop.f32.mrb[20].mxu0 }
 0x340   : > { %v762_v28 = vadd.f32 %v1091_v27, %v949_v18  ;;  %v753_v29 = vpop.f32.mrb[21].mxu0 }
 0x341   : > { %v754_v30 = vadd.f32 %v949_v18, %v753_v29  ;;  %v1092_v31 = vpop.f32.mrb[22].mxu0 }
 0x342   : > { %806 = vst [vmem:[%s1730_s12 + $0x30] sm:$0xff] %v762_v28  ;;  %v765_v32 = vadd.f32 %v1092_v31, %v949_v18  ;;  %v756_v33 = vpop.f32.mrb[23].mxu0 }
 0x343   : > { %804 = vst [vmem:[%s1730_s12 + $0x20] sm:$0xff] %v754_v30  ;;  %v757_v34 = vadd.f32 %v949_v18, %v756_v33 }
 0x344   : > { %807 = vst [vmem:[%s1730_s12 + $0x38] sm:$0xff] %v765_v32 }
 0x345   : > { %805 = vst [vmem:[%s1730_s12 + $0x28] sm:$0xff] %v757_v34 }
 0x347   : > { %v1095_v35 = vpop.f32.mrb[16].mxu1 }
 0x348   : > { %v778_v36 = vadd.f32 %v1095_v35, %v949_v18  ;;  %v769_v37 = vpop.f32.mrb[17].mxu1 }
 0x349   : > { %v770_v38 = vadd.f32 %v949_v18, %v769_v37  ;;  %v1096_v39 = vpop.f32.mrb[18].mxu1 }
 0x34a   : > { %810 = vst [vmem:[%s1730_s12 + $0x50] sm:$0xff] %v778_v36  ;;  %v781_v40 = vadd.f32 %v1096_v39, %v949_v18  ;;  %v772_v41 = vpop.f32.mrb[19].mxu1 }
 0x34b   : > { %808 = vst [vmem:[%s1730_s12 + $0x40] sm:$0xff] %v770_v38  ;;  %v773_v42 = vadd.f32 %v949_v18, %v772_v41 }
 0x34c   : > { %811 = vst [vmem:[%s1730_s12 + $0x58] sm:$0xff] %v781_v40 }
 0x34d   : > { %809 = vst [vmem:[%s1730_s12 + $0x48] sm:$0xff] %v773_v42 }
 0x34f   : > { %v1099_v43 = vpop.f32.mrb[20].mxu1 }
 0x350   : > { %v794_v44 = vadd.f32 %v1099_v43, %v949_v18  ;;  %v785_v45 = vpop.f32.mrb[21].mxu1 }
 0x351   : > { %v786_v46 = vadd.f32 %v949_v18, %v785_v45  ;;  %v1100_v47 = vpop.f32.mrb[22].mxu1 }
 0x352   : > { %814 = vst [vmem:[%s1730_s12 + $0x70] sm:$0xff] %v794_v44  ;;  %v797_v48 = vadd.f32 %v1100_v47, %v949_v18  ;;  %v788_v49 = vpop.f32.mrb[23].mxu1 }
 0x353   : > { %812 = vst [vmem:[%s1730_s12 + $0x60] sm:$0xff] %v786_v46  ;;  %v789_v50 = vadd.f32 %v949_v18, %v788_v49 }
 0x354   : > { %815 = vst [vmem:[%s1730_s12 + $0x78] sm:$0xff] %v797_v48 }
 0x355   : > { %813 = vst [vmem:[%s1730_s12 + $0x68] sm:$0xff] %v789_v50 }
 0x356   : > { %1325 = shalt.err (!%p1322_p4)
}
 0x357   : > { %s1326_s13 = scalar_lea.hbm %s1750_s23, 2048  ;;  %s1330_s14 = scalar_lea.hbm %s1805_s7, 6144 }
 0x358   : > { %p1327_p9 = scmp.ne.s32.totalorder %s1750_s23, %s1326_s13  ;;  %p1331_p8 = scmp.lt.u32.totalorder %s1750_s23, %s1805_s7 }
 0x359   : > { %p1332_p12 = scmp.lt.u32.totalorder %s1330_s14, %s1326_s13  ;;  %p1334_p0 = scmp.lt.u32.totalorder %s1326_s13, %s1750_s23 }
 0x35a   : > { %p1328_p13 = pnand %p1327_p9, %p1590_p5 }
 0x35b   : > { %p1333_p6 = por %p1332_p12, %p1331_p8 }
 0x35c   : > { %p1329_p10 = pneg %p1328_p13 }
 0x35d   : > { %p1335_p3 = por %p1334_p0, %p1333_p6 }
 0x35f   : > { %p1336_p7 = pnand %p1335_p3, %p1329_p10 }
 0x361   : > { %1339 = shalt.err (!%p1336_p7)
}
 0x362   : > { %s1395_s16 = smov 128   ;;  %s1396_s29 = smov 8  }
 0x363   : > { %1131 = dma.vmem_to_hbm [thread:$0]  (%p1590_p5), %s1752_s21, 2048, %s1750_s23, %s817_s28, %s1395_s16, %s1395_s16, %s1396_s29  }
 0x364 PF: > { %s1825_s11 = sld [smem:[#allocation15_spill]]  ;;  %p1158_p11 = scmp.ge.s32.totalorder %s1386_s27, 2 }
 0x365   : > { %s845_s8 = sand.u32 1, %s1374_s24  }
 0x366   : > { %s846_s30 = scalar_lea.sflag [#allocation4], %s845_s8 }
 0x36a   : > { %p1826_p1 = scmp.ne.s32.totalorder %s1825_s11, 0 }
 0x36c   : > { %p1148_p2 = pnand %p1158_p11, %p1826_p1 }
 0x36e   : > { %1369 = dma.done.wait (!%p1148_p2), %s846_s30, 2048  }
 0x36f   : > { %1371 = vsyncadd (!%p1148_p2), %s846_s30, 4294965248  ;;  %p22_p4 = scmp.ge.s32.totalorder %s1576_s22, 5   ;;  %s1827_s24 = smov %s1378_s25 }
 0x370   : > { %s1828_s25 = smov %s1382_s26  ;;  %s1829_s26 = smov %s1586_s18 }
 0x371   : > { %s1830_s27 = smov %s1576_s22  ;;  %24 = sbr.rel (!%p22_p4) target bundleno = 7 (0x7), region = 105 }
 0x378   :  { %851 = vsyncpa [#allocation3], 1 }
 0x379   :  { %853 = vsyncpa [#allocation3 + $0x1], 1 }
 0x37a   :  { %854 = vsyncpa [#allocation6], 1 }
 0x37b   :  { %855 = vsyncpa [#allocation9], 1 }
 0x37c   :  { %856 = vsyncpa [#allocation4], 1 }
 0x37d   :  { %858 = vsyncpa [#allocation4 + $0x1], 1 }

</bundles_post_ra>
